<compile_context>
chip_gen: v7x
topology: tpu7x:2x2x1
jax: 0.10.0
libtpu: 0.0.40
codegen_flags: <defaults>
</compile_context>

<pallas_src>
import jax
import jax.numpy as jnp
import numpy as np
from functools import partial
from jax import lax
from jax.experimental import pallas as pl
from jax.experimental.pallas import tpu as pltpu


# ----------------------------------------------------------------------------
# Fused Pallas kernel: one (stream, batch) pair per grid step.
#   q comes from stream s, k/v from stream 1-s (cross-attention), then out proj.
# ----------------------------------------------------------------------------
def _mutual_attention_kernel(
    xq_ref, xkv_ref,              # (1, 1, N, C) query-stream / kv-stream activations
    q_w_ref, q_b_ref,             # (1, C, C), (1, 1, C)   -- scale pre-folded
    kv_w_ref, kv_b_ref,           # (1, C, 2C), (1, 1, 2C) -- [K | V] of the other stream
    proj_w_ref, proj_b_ref,       # (1, C, C), (1, 1, C)
    out_ref,                      # (1, 1, N, C)
    ctx_ref,                      # VMEM scratch (N, C), compute dtype
    *, num_heads, approx_reciprocal,
):
    C = xq_ref.shape[-1]
    H = num_heads
    D = C // H
    cdt = xq_ref.dtype            # matmul input dtype (bf16 for perf runs, f32 for test)

    xq = xq_ref[0, 0]             # (N, C)
    xkv = xkv_ref[0, 0]           # (N, C)

    # Projections: MXU matmuls in the input dtype, f32 accumulation.
    q = jnp.dot(xq, q_w_ref[0], preferred_element_type=jnp.float32) + q_b_ref[0]     # (N, C)
    kv = jnp.dot(xkv, kv_w_ref[0], preferred_element_type=jnp.float32) + kv_b_ref[0]  # (N, 2C)

    # Single cast per stream (no per-head slice casts).
    q_c = q.astype(cdt)
    k_c = kv[:, :C].astype(cdt)
    v_c = kv[:, C:].astype(cdt)

    # NT contraction: contract the D axis of q and k directly (no kh.T transpose).
    nt_dims = (((1,), (1,)), ((), ()))

    # Static unroll over heads -> static lane offsets for all slices/stores.
    for h in range(H):
        sl = slice(h * D, (h + 1) * D)
        qh, kh, vh = q_c[:, sl], k_c[:, sl], v_c[:, sl]

        s = lax.dot_general(qh, kh, nt_dims, preferred_element_type=jnp.float32)  # (N, N)
        s = s - jnp.max(s, axis=-1, keepdims=True)
        p = jnp.exp(s)                                                            # unnormalized
        r = pl.reciprocal(jnp.sum(p, axis=-1, keepdims=True),
                          approx=approx_reciprocal)                               # (N, 1)

        # attn_drop has p=0.0 -> identity (inference semantics).
        acc = jnp.dot(p.astype(cdt), vh, preferred_element_type=jnp.float32)      # (N, D)
        # Normalize AFTER the PV matmul: O(N*D) multiplies instead of O(N*N).
        ctx_ref[:, sl] = (acc * r).astype(cdt)

    # Merge-heads is just the scratch slab; one K=C proj matmul.  proj_drop p=0 -> identity.
    out = (jnp.dot(ctx_ref[...], proj_w_ref[0], preferred_element_type=jnp.float32)
           + proj_b_ref[0])
    out_ref[0, 0] = out.astype(out_ref.dtype)


# ----------------------------------------------------------------------------
# VMEM budget derived from the footprint, clamped to the device capacity.
# ----------------------------------------------------------------------------
def _pick_vmem_limit(N, C, cdt_bytes, out_bytes):
    weights = (4 * C * C + 4 * C) * cdt_bytes                 # q_w + kv_w + proj_w + biases
    acts = 2 * N * C * cdt_bytes + N * C * out_bytes          # two input blocks + output block
    pipeline = 2 * (weights + acts)                           # default double-buffering
    temps = 3 * N * C * 4 + 2 * N * N * 4 + N * C * cdt_bytes  # f32 q/kv, scores+exp, ctx scratch
    est = pipeline + temps
    try:
        cap = pltpu.get_tpu_info().vmem_capacity_bytes        # 128 MiB v5e/v6e, 64 MiB v7x
    except Exception:
        cap = 64 * 1024 * 1024                                # conservative fallback (v7x)
    return int(max(32 * 1024 * 1024, min(2 * est, int(0.85 * cap))))


# ----------------------------------------------------------------------------
# Wrapper around pallas_call
# ----------------------------------------------------------------------------
def mutual_attention_forward(rgb_fea, depth_fea, fused, num_heads, *,
                             approx_reciprocal=False, vmem_limit_bytes=None):
    """rgb_fea, depth_fea: (B, N, C).  Returns (rgb_out, depth_out), each (B, N, C)."""
    B, N, C = rgb_fea.shape
    H = num_heads
    out_dtype = rgb_fea.dtype
    cdt = fused["q_w"].dtype                       # compute dtype comes from the fused weights
    cdt_bytes = jnp.dtype(cdt).itemsize
    out_bytes = jnp.dtype(out_dtype).itemsize

    # Stack the two streams so a single (stream, batch) grid covers both
    # cross-attentions; index_map (1 - s) fetches the other stream's tokens for K/V.
    x = jnp.stack([rgb_fea, depth_fea], axis=0).astype(cdt)   # (2, B, N, C)

    act_spec_q = pl.BlockSpec((1, 1, N, C), lambda s, b: (s, b, 0, 0))
    act_spec_kv = pl.BlockSpec((1, 1, N, C), lambda s, b: (1 - s, b, 0, 0))
    out_spec = pl.BlockSpec((1, 1, N, C), lambda s, b: (s, b, 0, 0))

    def w_spec(shape):
        # Stream-indexed weights: re-fetched only when the (outer) stream axis
        # changes -> twice total, or once per TensorCore under megacore sharding.
        return pl.BlockSpec((1,) + shape, lambda s, b: (s,) + (0,) * len(shape))

    if vmem_limit_bytes is None:
        vmem_limit_bytes = _pick_vmem_limit(N, C, cdt_bytes, out_bytes)

    kernel = partial(_mutual_attention_kernel, num_heads=H,
                     approx_reciprocal=approx_reciprocal)

    flops = 2 * B * (8 * N * C * C + 4 * N * N * C)
    transcendentals = 2 * B * H * N * N
    bytes_accessed = (4 * B * N * C + 8 * C * C + 8 * C) * cdt_bytes + 2 * B * N * C * out_bytes

    out = pl.pallas_call(
        kernel,
        out_shape=jax.ShapeDtypeStruct((2, B, N, C), out_dtype),
        grid=(2, B),
        in_specs=[
            act_spec_q, act_spec_kv,
            w_spec((C, C)), w_spec((1, C)),            # q_w, q_b   (scale folded in)
            w_spec((C, 2 * C)), w_spec((1, 2 * C)),    # kv_w, kv_b (other stream's K|V)
            w_spec((C, C)), w_spec((1, C)),            # proj_w, proj_b
        ],
        out_specs=out_spec,
        scratch_shapes=[pltpu.VMEM((N, C), cdt)],      # merged-head context slab
        compiler_params=pltpu.CompilerParams(
            dimension_semantics=("parallel", "parallel"),   # stream & batch shard across TCs
            vmem_limit_bytes=vmem_limit_bytes,
        ),
        cost_estimate=pl.CostEstimate(flops=flops, transcendentals=transcendentals,
                                      bytes_accessed=bytes_accessed),
    )(
        x, x,
        fused["q_w"], fused["q_b"],
        fused["kv_w"], fused["kv_b"],
        fused["proj_w"], fused["proj_b"],
    )
    return out[0], out[1]


# ----------------------------------------------------------------------------
# Parameter init (PyTorch-Linear-like uniform, weights stored as (in, out))
# ----------------------------------------------------------------------------
def init_params(key, dim, qkv_bias=False):
    names = ["rgb_q", "rgb_k", "rgb_v", "rgb_proj",
             "depth_q", "depth_k", "depth_v", "depth_proj"]
    params = {}
    bound = 1.0 / np.sqrt(dim)
    keys = jax.random.split(key, 2 * len(names))
    for i, name in enumerate(names):
        wk, bk = keys[2 * i], keys[2 * i + 1]
        params[name + "_w"] = jax.random.uniform(
            wk, (dim, dim), jnp.float32, -bound, bound)
        has_bias = name.endswith("proj") or qkv_bias
        if has_bias:
            params[name + "_b"] = jax.random.uniform(
                bk, (dim,), jnp.float32, -bound, bound)
        else:
            params[name + "_b"] = jnp.zeros((dim,), jnp.float32)
    return params


def fuse_params(params, dim, num_heads, dtype=jnp.float32, qk_scale=None):
    """Stack per-stream weights along a leading stream axis, fuse [K|V] of the
    *other* stream for the cross-attention, fold the softmax scale into q, and
    cast to the compute dtype (bf16 for production, f32 for the exact test)."""
    D = dim // num_heads
    scale = qk_scale if qk_scale is not None else D ** -0.5
    f = lambda x: jnp.asarray(x, jnp.float32)

    q_w = jnp.stack([f(params["rgb_q_w"]) * scale, f(params["depth_q_w"]) * scale])
    q_b = jnp.stack([f(params["rgb_q_b"]) * scale, f(params["depth_q_b"]) * scale])[:, None, :]
    kv_w = jnp.stack([
        jnp.concatenate([f(params["depth_k_w"]), f(params["depth_v_w"])], axis=1),  # rgb query
        jnp.concatenate([f(params["rgb_k_w"]), f(params["rgb_v_w"])], axis=1),      # depth query
    ])
    kv_b = jnp.stack([
        jnp.concatenate([f(params["depth_k_b"]), f(params["depth_v_b"])]),
        jnp.concatenate([f(params["rgb_k_b"]), f(params["rgb_v_b"])]),
    ])[:, None, :]
    proj_w = jnp.stack([f(params["rgb_proj_w"]), f(params["depth_proj_w"])])
    proj_b = jnp.stack([f(params["rgb_proj_b"]), f(params["depth_proj_b"])])[:, None, :]

    fused = dict(q_w=q_w, q_b=q_b, kv_w=kv_w, kv_b=kv_b, proj_w=proj_w, proj_b=proj_b)
    return {k: v.astype(dtype) for k, v in fused.items()}


# ----------------------------------------------------------------------------
# Pure-JAX reference (mirrors the PyTorch module)
# ----------------------------------------------------------------------------
def reference_forward(rgb_fea, depth_fea, params, num_heads):
    B, N, C = rgb_fea.shape
    H, D = num_heads, C // num_heads
    scale = D ** -0.5

    def lin(x, name):
        return x @ params[name + "_w"] + params[name + "_b"]

    def split(x):
        return x.reshape(B, N, H, D).transpose(0, 2, 1, 3)

    rq, rk, rv = (split(lin(rgb_fea, "rgb_q")), split(lin(rgb_fea, "rgb_k")),
                  split(lin(rgb_fea, "rgb_v")))
    dq, dk, dv = (split(lin(depth_fea, "depth_q")), split(lin(depth_fea, "depth_k")),
                  split(lin(depth_fea, "depth_v")))

    ra = jax.nn.softmax(jnp.einsum("bhnd,bhmd->bhnm", rq, dk) * scale, axis=-1)
    rgb_out = jnp.einsum("bhnm,bhmd->bhnd", ra, dv).transpose(0, 2, 1, 3).reshape(B, N, C)
    rgb_out = rgb_out @ params["rgb_proj_w"] + params["rgb_proj_b"]

    da = jax.nn.softmax(jnp.einsum("bhnd,bhmd->bhnm", dq, rk) * scale, axis=-1)
    depth_out = jnp.einsum("bhnm,bhmd->bhnd", da, rv).transpose(0, 2, 1, 3).reshape(B, N, C)
    depth_out = depth_out @ params["depth_proj_w"] + params["depth_proj_b"]
    return rgb_out, depth_out


if __name__ == "__main__":
    B, N, C, H = 2, 16, 32, 8   # head_dim = 4 (tiny correctness config)

    key = jax.random.PRNGKey(0)
    k_rgb, k_depth, k_params = jax.random.split(key, 3)
    rgb_fea = jax.random.normal(k_rgb, (B, N, C), jnp.float32)
    depth_fea = jax.random.normal(k_depth, (B, N, C), jnp.float32)

    params = init_params(k_params, C, qkv_bias=False)
    rgb_ref, depth_ref = reference_forward(rgb_fea, depth_fea, params, H)

    # ---- exact f32 path: matches the PyTorch/f32 reference to 1e-5 ----
    fused_f32 = fuse_params(params, C, H, dtype=jnp.float32)
    fwd_f32 = jax.jit(partial(mutual_attention_forward, num_heads=H))
    rgb_out, depth_out = fwd_f32(rgb_fea, depth_fea, fused_f32)
    jax.block_until_ready((rgb_out, depth_out))
    np.testing.assert_allclose(np.asarray(rgb_out), np.asarray(rgb_ref),
                               rtol=1e-5, atol=1e-5)
    np.testing.assert_allclose(np.asarray(depth_out), np.asarray(depth_ref),
                               rtol=1e-5, atol=1e-5)

    # ---- bf16 production path: MXU-native matmuls, f32 accumulation ----
    fused_bf16 = fuse_params(params, C, H, dtype=jnp.bfloat16)
    fwd_bf16 = jax.jit(partial(mutual_attention_forward, num_heads=H,
                               approx_reciprocal=True))
    rgb_out_bf, depth_out_bf = fwd_bf16(rgb_fea, depth_fea, fused_bf16)
    jax.block_until_ready((rgb_out_bf, depth_out_bf))
    np.testing.assert_allclose(np.asarray(rgb_out_bf), np.asarray(rgb_ref),
                               rtol=1e-1, atol=1e-1)
    np.testing.assert_allclose(np.asarray(depth_out_bf), np.asarray(depth_ref),
                               rtol=1e-1, atol=1e-1)

    print("KERNEL_OK")
</pallas_src>

<mosaic_0001>
module attributes {stable_mosaic.version = 11 : i64} {
  func.func @_mutual_attention_kernel(%arg0: i32, %arg1: i32, %arg2: memref<1x1x16x32xf32, #tpu.memory_space<vmem>>, %arg3: memref<1x1x16x32xf32, #tpu.memory_space<vmem>>, %arg4: memref<1x32x32xf32, #tpu.memory_space<vmem>>, %arg5: memref<1x1x32xf32, #tpu.memory_space<vmem>>, %arg6: memref<1x32x64xf32, #tpu.memory_space<vmem>>, %arg7: memref<1x1x64xf32, #tpu.memory_space<vmem>>, %arg8: memref<1x32x32xf32, #tpu.memory_space<vmem>>, %arg9: memref<1x1x32xf32, #tpu.memory_space<vmem>>, %arg10: memref<1x1x16x32xf32, #tpu.memory_space<vmem>>, %arg11: memref<16x32xf32, #tpu.memory_space<vmem>>) attributes {dimension_semantics = [#tpu.dimension_semantics<parallel>, #tpu.dimension_semantics<parallel>], iteration_bounds = array<i64: 2, 2>, scalar_prefetch = 0 : i64, scratch_operands = 1 : i64, tpu.core_type = #tpu.core_type<tc>, window_params = [{transform_indices = @transform_0, window_bounds = array<i64: 1, 1, 16, 32>}, {transform_indices = @transform_1, window_bounds = array<i64: 1, 1, 16, 32>}, {transform_indices = @transform_2, window_bounds = array<i64: 1, 32, 32>}, {transform_indices = @transform_3, window_bounds = array<i64: 1, 1, 32>}, {transform_indices = @transform_4, window_bounds = array<i64: 1, 32, 64>}, {transform_indices = @transform_5, window_bounds = array<i64: 1, 1, 64>}, {transform_indices = @transform_6, window_bounds = array<i64: 1, 32, 32>}, {transform_indices = @transform_7, window_bounds = array<i64: 1, 1, 32>}, {transform_indices = @transform_8, window_bounds = array<i64: 1, 1, 16, 32>}]} {
    %c0 = arith.constant 0 : index
    %c0_0 = arith.constant 0 : index
    %c0_1 = arith.constant 0 : index
    %c0_2 = arith.constant 0 : index
    %0 = vector.load %arg2[%c0, %c0_0, %c0_1, %c0_2] : memref<1x1x16x32xf32, #tpu.memory_space<vmem>>, vector<1x1x16x32xf32>
    %1 = vector.shape_cast %0 : vector<1x1x16x32xf32> to vector<16x32xf32>
    %c0_3 = arith.constant 0 : index
    %c0_4 = arith.constant 0 : index
    %c0_5 = arith.constant 0 : index
    %c0_6 = arith.constant 0 : index
    %2 = vector.load %arg3[%c0_3, %c0_4, %c0_5, %c0_6] : memref<1x1x16x32xf32, #tpu.memory_space<vmem>>, vector<1x1x16x32xf32>
    %3 = vector.shape_cast %2 : vector<1x1x16x32xf32> to vector<16x32xf32>
    %c0_7 = arith.constant 0 : index
    %c0_8 = arith.constant 0 : index
    %c0_9 = arith.constant 0 : index
    %4 = vector.load %arg4[%c0_7, %c0_8, %c0_9] : memref<1x32x32xf32, #tpu.memory_space<vmem>>, vector<1x32x32xf32>
    %5 = vector.shape_cast %4 : vector<1x32x32xf32> to vector<32x32xf32>
    %cst = arith.constant dense<0.000000e+00> : vector<16x32xf32>
    %6 = tpu.matmul %1, %5, %cst {dimension_numbers = #tpu.dot_dimension_numbers<[1], [0], [0], [1], [0, 0, 1, 1], [], []>} : vector<16x32xf32>, vector<32x32xf32>, vector<16x32xf32> -> vector<16x32xf32>
    %c0_10 = arith.constant 0 : index
    %c0_11 = arith.constant 0 : index
    %c0_12 = arith.constant 0 : index
    %7 = vector.load %arg5[%c0_10, %c0_11, %c0_12] : memref<1x1x32xf32, #tpu.memory_space<vmem>>, vector<1x1x32xf32>
    %8 = vector.shape_cast %7 : vector<1x1x32xf32> to vector<1x32xf32>
    %9 = vector.broadcast %8 : vector<1x32xf32> to vector<16x32xf32>
    %10 = arith.addf %6, %9 : vector<16x32xf32>
    %c0_13 = arith.constant 0 : index
    %c0_14 = arith.constant 0 : index
    %c0_15 = arith.constant 0 : index
    %11 = vector.load %arg6[%c0_13, %c0_14, %c0_15] : memref<1x32x64xf32, #tpu.memory_space<vmem>>, vector<1x32x64xf32>
    %12 = vector.shape_cast %11 : vector<1x32x64xf32> to vector<32x64xf32>
    %cst_16 = arith.constant dense<0.000000e+00> : vector<16x64xf32>
    %13 = tpu.matmul %3, %12, %cst_16 {dimension_numbers = #tpu.dot_dimension_numbers<[1], [0], [0], [1], [0, 0, 1, 1], [], []>} : vector<16x32xf32>, vector<32x64xf32>, vector<16x64xf32> -> vector<16x64xf32>
    %c0_17 = arith.constant 0 : index
    %c0_18 = arith.constant 0 : index
    %c0_19 = arith.constant 0 : index
    %14 = vector.load %arg7[%c0_17, %c0_18, %c0_19] : memref<1x1x64xf32, #tpu.memory_space<vmem>>, vector<1x1x64xf32>
    %15 = vector.shape_cast %14 : vector<1x1x64xf32> to vector<1x64xf32>
    %16 = vector.broadcast %15 : vector<1x64xf32> to vector<16x64xf32>
    %17 = arith.addf %13, %16 : vector<16x64xf32>
    %18 = vector.extract_strided_slice %17 {offsets = [0, 0], sizes = [16, 32], strides = [1, 1]} : vector<16x64xf32> to vector<16x32xf32>
    %19 = vector.extract_strided_slice %17 {offsets = [0, 32], sizes = [16, 32], strides = [1, 1]} : vector<16x64xf32> to vector<16x32xf32>
    %20 = vector.extract_strided_slice %10 {offsets = [0, 0], sizes = [16, 4], strides = [1, 1]} : vector<16x32xf32> to vector<16x4xf32>
    %21 = vector.extract_strided_slice %18 {offsets = [0, 0], sizes = [16, 4], strides = [1, 1]} : vector<16x32xf32> to vector<16x4xf32>
    %22 = vector.extract_strided_slice %19 {offsets = [0, 0], sizes = [16, 4], strides = [1, 1]} : vector<16x32xf32> to vector<16x4xf32>
    %cst_20 = arith.constant dense<0.000000e+00> : vector<16x16xf32>
    %23 = tpu.matmul %20, %21, %cst_20 {dimension_numbers = #tpu.dot_dimension_numbers<[1], [1], [0], [0], [0, 0, 1, 0], [], []>} : vector<16x4xf32>, vector<16x4xf32>, vector<16x16xf32> -> vector<16x16xf32>
    %cst_21 = arith.constant dense<0xFF800000> : vector<16xf32>
    %24 = vector.multi_reduction <maximumf>, %23, %cst_21 [1] : vector<16x16xf32> to vector<16xf32>
    %25 = vector.shape_cast %24 : vector<16xf32> to vector<16x1xf32>
    %26 = vector.broadcast %25 : vector<16x1xf32> to vector<16x16xf32>
    %27 = arith.subf %23, %26 : vector<16x16xf32>
    %28 = math.exp %27 : vector<16x16xf32>
    %cst_22 = arith.constant dense<0.000000e+00> : vector<16xf32>
    %29 = vector.multi_reduction <add>, %28, %cst_22 [1] : vector<16x16xf32> to vector<16xf32>
    %30 = vector.shape_cast %29 : vector<16xf32> to vector<16x1xf32>
    %31 = tpu.reciprocal %30 : vector<16x1xf32> -> vector<16x1xf32>
    %cst_23 = arith.constant dense<0.000000e+00> : vector<16x4xf32>
    %32 = tpu.matmul %28, %22, %cst_23 {dimension_numbers = #tpu.dot_dimension_numbers<[1], [0], [0], [1], [0, 0, 1, 1], [], []>} : vector<16x16xf32>, vector<16x4xf32>, vector<16x4xf32> -> vector<16x4xf32>
    %33 = vector.broadcast %31 : vector<16x1xf32> to vector<16x4xf32>
    %34 = arith.mulf %32, %33 : vector<16x4xf32>
    %c0_24 = arith.constant 0 : index
    %c0_25 = arith.constant 0 : index
    %35 = vector.load %arg11[%c0_24, %c0_25] : memref<16x32xf32, #tpu.memory_space<vmem>>, vector<16x4xf32>
    tpu.vector_store %arg11[%c0_24, %c0_25], %34 {strides = array<i32>} : memref<16x32xf32, #tpu.memory_space<vmem>>, vector<16x4xf32>,
    %36 = vector.extract_strided_slice %10 {offsets = [0, 4], sizes = [16, 4], strides = [1, 1]} : vector<16x32xf32> to vector<16x4xf32>
    %37 = vector.extract_strided_slice %18 {offsets = [0, 4], sizes = [16, 4], strides = [1, 1]} : vector<16x32xf32> to vector<16x4xf32>
    %38 = vector.extract_strided_slice %19 {offsets = [0, 4], sizes = [16, 4], strides = [1, 1]} : vector<16x32xf32> to vector<16x4xf32>
    %cst_26 = arith.constant dense<0.000000e+00> : vector<16x16xf32>
    %39 = tpu.matmul %36, %37, %cst_26 {dimension_numbers = #tpu.dot_dimension_numbers<[1], [1], [0], [0], [0, 0, 1, 0], [], []>} : vector<16x4xf32>, vector<16x4xf32>, vector<16x16xf32> -> vector<16x16xf32>
    %cst_27 = arith.constant dense<0xFF800000> : vector<16xf32>
    %40 = vector.multi_reduction <maximumf>, %39, %cst_27 [1] : vector<16x16xf32> to vector<16xf32>
    %41 = vector.shape_cast %40 : vector<16xf32> to vector<16x1xf32>
    %42 = vector.broadcast %41 : vector<16x1xf32> to vector<16x16xf32>
    %43 = arith.subf %39, %42 : vector<16x16xf32>
    %44 = math.exp %43 : vector<16x16xf32>
    %cst_28 = arith.constant dense<0.000000e+00> : vector<16xf32>
    %45 = vector.multi_reduction <add>, %44, %cst_28 [1] : vector<16x16xf32> to vector<16xf32>
    %46 = vector.shape_cast %45 : vector<16xf32> to vector<16x1xf32>
    %47 = tpu.reciprocal %46 : vector<16x1xf32> -> vector<16x1xf32>
    %cst_29 = arith.constant dense<0.000000e+00> : vector<16x4xf32>
    %48 = tpu.matmul %44, %38, %cst_29 {dimension_numbers = #tpu.dot_dimension_numbers<[1], [0], [0], [1], [0, 0, 1, 1], [], []>} : vector<16x16xf32>, vector<16x4xf32>, vector<16x4xf32> -> vector<16x4xf32>
    %49 = vector.broadcast %47 : vector<16x1xf32> to vector<16x4xf32>
    %50 = arith.mulf %48, %49 : vector<16x4xf32>
    %c0_30 = arith.constant 0 : index
    %c4 = arith.constant 4 : index
    %51 = vector.load %arg11[%c0_30, %c4] : memref<16x32xf32, #tpu.memory_space<vmem>>, vector<16x4xf32>
    tpu.vector_store %arg11[%c0_30, %c4], %50 {strides = array<i32>} : memref<16x32xf32, #tpu.memory_space<vmem>>, vector<16x4xf32>,
    %52 = vector.extract_strided_slice %10 {offsets = [0, 8], sizes = [16, 4], strides = [1, 1]} : vector<16x32xf32> to vector<16x4xf32>
    %53 = vector.extract_strided_slice %18 {offsets = [0, 8], sizes = [16, 4], strides = [1, 1]} : vector<16x32xf32> to vector<16x4xf32>
    %54 = vector.extract_strided_slice %19 {offsets = [0, 8], sizes = [16, 4], strides = [1, 1]} : vector<16x32xf32> to vector<16x4xf32>
    %cst_31 = arith.constant dense<0.000000e+00> : vector<16x16xf32>
    %55 = tpu.matmul %52, %53, %cst_31 {dimension_numbers = #tpu.dot_dimension_numbers<[1], [1], [0], [0], [0, 0, 1, 0], [], []>} : vector<16x4xf32>, vector<16x4xf32>, vector<16x16xf32> -> vector<16x16xf32>
    %cst_32 = arith.constant dense<0xFF800000> : vector<16xf32>
    %56 = vector.multi_reduction <maximumf>, %55, %cst_32 [1] : vector<16x16xf32> to vector<16xf32>
    %57 = vector.shape_cast %56 : vector<16xf32> to vector<16x1xf32>
    %58 = vector.broadcast %57 : vector<16x1xf32> to vector<16x16xf32>
    %59 = arith.subf %55, %58 : vector<16x16xf32>
    %60 = math.exp %59 : vector<16x16xf32>
    %cst_33 = arith.constant dense<0.000000e+00> : vector<16xf32>
    %61 = vector.multi_reduction <add>, %60, %cst_33 [1] : vector<16x16xf32> to vector<16xf32>
    %62 = vector.shape_cast %61 : vector<16xf32> to vector<16x1xf32>
    %63 = tpu.reciprocal %62 : vector<16x1xf32> -> vector<16x1xf32>
    %cst_34 = arith.constant dense<0.000000e+00> : vector<16x4xf32>
    %64 = tpu.matmul %60, %54, %cst_34 {dimension_numbers = #tpu.dot_dimension_numbers<[1], [0], [0], [1], [0, 0, 1, 1], [], []>} : vector<16x16xf32>, vector<16x4xf32>, vector<16x4xf32> -> vector<16x4xf32>
    %65 = vector.broadcast %63 : vector<16x1xf32> to vector<16x4xf32>
    %66 = arith.mulf %64, %65 : vector<16x4xf32>
    %c0_35 = arith.constant 0 : index
    %c8 = arith.constant 8 : index
    %67 = vector.load %arg11[%c0_35, %c8] : memref<16x32xf32, #tpu.memory_space<vmem>>, vector<16x4xf32>
    tpu.vector_store %arg11[%c0_35, %c8], %66 {strides = array<i32>} : memref<16x32xf32, #tpu.memory_space<vmem>>, vector<16x4xf32>,
    %68 = vector.extract_strided_slice %10 {offsets = [0, 12], sizes = [16, 4], strides = [1, 1]} : vector<16x32xf32> to vector<16x4xf32>
    %69 = vector.extract_strided_slice %18 {offsets = [0, 12], sizes = [16, 4], strides = [1, 1]} : vector<16x32xf32> to vector<16x4xf32>
    %70 = vector.extract_strided_slice %19 {offsets = [0, 12], sizes = [16, 4], strides = [1, 1]} : vector<16x32xf32> to vector<16x4xf32>
    %cst_36 = arith.constant dense<0.000000e+00> : vector<16x16xf32>
    %71 = tpu.matmul %68, %69, %cst_36 {dimension_numbers = #tpu.dot_dimension_numbers<[1], [1], [0], [0], [0, 0, 1, 0], [], []>} : vector<16x4xf32>, vector<16x4xf32>, vector<16x16xf32> -> vector<16x16xf32>
    %cst_37 = arith.constant dense<0xFF800000> : vector<16xf32>
    %72 = vector.multi_reduction <maximumf>, %71, %cst_37 [1] : vector<16x16xf32> to vector<16xf32>
    %73 = vector.shape_cast %72 : vector<16xf32> to vector<16x1xf32>
    %74 = vector.broadcast %73 : vector<16x1xf32> to vector<16x16xf32>
    %75 = arith.subf %71, %74 : vector<16x16xf32>
    %76 = math.exp %75 : vector<16x16xf32>
    %cst_38 = arith.constant dense<0.000000e+00> : vector<16xf32>
    %77 = vector.multi_reduction <add>, %76, %cst_38 [1] : vector<16x16xf32> to vector<16xf32>
    %78 = vector.shape_cast %77 : vector<16xf32> to vector<16x1xf32>
    %79 = tpu.reciprocal %78 : vector<16x1xf32> -> vector<16x1xf32>
    %cst_39 = arith.constant dense<0.000000e+00> : vector<16x4xf32>
    %80 = tpu.matmul %76, %70, %cst_39 {dimension_numbers = #tpu.dot_dimension_numbers<[1], [0], [0], [1], [0, 0, 1, 1], [], []>} : vector<16x16xf32>, vector<16x4xf32>, vector<16x4xf32> -> vector<16x4xf32>
    %81 = vector.broadcast %79 : vector<16x1xf32> to vector<16x4xf32>
    %82 = arith.mulf %80, %81 : vector<16x4xf32>
    %c0_40 = arith.constant 0 : index
    %c12 = arith.constant 12 : index
    %83 = vector.load %arg11[%c0_40, %c12] : memref<16x32xf32, #tpu.memory_space<vmem>>, vector<16x4xf32>
    tpu.vector_store %arg11[%c0_40, %c12], %82 {strides = array<i32>} : memref<16x32xf32, #tpu.memory_space<vmem>>, vector<16x4xf32>,
    %84 = vector.extract_strided_slice %10 {offsets = [0, 16], sizes = [16, 4], strides = [1, 1]} : vector<16x32xf32> to vector<16x4xf32>
    %85 = vector.extract_strided_slice %18 {offsets = [0, 16], sizes = [16, 4], strides = [1, 1]} : vector<16x32xf32> to vector<16x4xf32>
    %86 = vector.extract_strided_slice %19 {offsets = [0, 16], sizes = [16, 4], strides = [1, 1]} : vector<16x32xf32> to vector<16x4xf32>
    %cst_41 = arith.constant dense<0.000000e+00> : vector<16x16xf32>
    %87 = tpu.matmul %84, %85, %cst_41 {dimension_numbers = #tpu.dot_dimension_numbers<[1], [1], [0], [0], [0, 0, 1, 0], [], []>} : vector<16x4xf32>, vector<16x4xf32>, vector<16x16xf32> -> vector<16x16xf32>
    %cst_42 = arith.constant dense<0xFF800000> : vector<16xf32>
    %88 = vector.multi_reduction <maximumf>, %87, %cst_42 [1] : vector<16x16xf32> to vector<16xf32>
    %89 = vector.shape_cast %88 : vector<16xf32> to vector<16x1xf32>
    %90 = vector.broadcast %89 : vector<16x1xf32> to vector<16x16xf32>
    %91 = arith.subf %87, %90 : vector<16x16xf32>
    %92 = math.exp %91 : vector<16x16xf32>
    %cst_43 = arith.constant dense<0.000000e+00> : vector<16xf32>
    %93 = vector.multi_reduction <add>, %92, %cst_43 [1] : vector<16x16xf32> to vector<16xf32>
    %94 = vector.shape_cast %93 : vector<16xf32> to vector<16x1xf32>
    %95 = tpu.reciprocal %94 : vector<16x1xf32> -> vector<16x1xf32>
    %cst_44 = arith.constant dense<0.000000e+00> : vector<16x4xf32>
    %96 = tpu.matmul %92, %86, %cst_44 {dimension_numbers = #tpu.dot_dimension_numbers<[1], [0], [0], [1], [0, 0, 1, 1], [], []>} : vector<16x16xf32>, vector<16x4xf32>, vector<16x4xf32> -> vector<16x4xf32>
    %97 = vector.broadcast %95 : vector<16x1xf32> to vector<16x4xf32>
    %98 = arith.mulf %96, %97 : vector<16x4xf32>
    %c0_45 = arith.constant 0 : index
    %c16 = arith.constant 16 : index
    %99 = vector.load %arg11[%c0_45, %c16] : memref<16x32xf32, #tpu.memory_space<vmem>>, vector<16x4xf32>
    tpu.vector_store %arg11[%c0_45, %c16], %98 {strides = array<i32>} : memref<16x32xf32, #tpu.memory_space<vmem>>, vector<16x4xf32>,
    %100 = vector.extract_strided_slice %10 {offsets = [0, 20], sizes = [16, 4], strides = [1, 1]} : vector<16x32xf32> to vector<16x4xf32>
    %101 = vector.extract_strided_slice %18 {offsets = [0, 20], sizes = [16, 4], strides = [1, 1]} : vector<16x32xf32> to vector<16x4xf32>
    %102 = vector.extract_strided_slice %19 {offsets = [0, 20], sizes = [16, 4], strides = [1, 1]} : vector<16x32xf32> to vector<16x4xf32>
    %cst_46 = arith.constant dense<0.000000e+00> : vector<16x16xf32>
    %103 = tpu.matmul %100, %101, %cst_46 {dimension_numbers = #tpu.dot_dimension_numbers<[1], [1], [0], [0], [0, 0, 1, 0], [], []>} : vector<16x4xf32>, vector<16x4xf32>, vector<16x16xf32> -> vector<16x16xf32>
    %cst_47 = arith.constant dense<0xFF800000> : vector<16xf32>
    %104 = vector.multi_reduction <maximumf>, %103, %cst_47 [1] : vector<16x16xf32> to vector<16xf32>
    %105 = vector.shape_cast %104 : vector<16xf32> to vector<16x1xf32>
    %106 = vector.broadcast %105 : vector<16x1xf32> to vector<16x16xf32>
    %107 = arith.subf %103, %106 : vector<16x16xf32>
    %108 = math.exp %107 : vector<16x16xf32>
    %cst_48 = arith.constant dense<0.000000e+00> : vector<16xf32>
    %109 = vector.multi_reduction <add>, %108, %cst_48 [1] : vector<16x16xf32> to vector<16xf32>
    %110 = vector.shape_cast %109 : vector<16xf32> to vector<16x1xf32>
    %111 = tpu.reciprocal %110 : vector<16x1xf32> -> vector<16x1xf32>
    %cst_49 = arith.constant dense<0.000000e+00> : vector<16x4xf32>
    %112 = tpu.matmul %108, %102, %cst_49 {dimension_numbers = #tpu.dot_dimension_numbers<[1], [0], [0], [1], [0, 0, 1, 1], [], []>} : vector<16x16xf32>, vector<16x4xf32>, vector<16x4xf32> -> vector<16x4xf32>
    %113 = vector.broadcast %111 : vector<16x1xf32> to vector<16x4xf32>
    %114 = arith.mulf %112, %113 : vector<16x4xf32>
    %c0_50 = arith.constant 0 : index
    %c20 = arith.constant 20 : index
    %115 = vector.load %arg11[%c0_50, %c20] : memref<16x32xf32, #tpu.memory_space<vmem>>, vector<16x4xf32>
    tpu.vector_store %arg11[%c0_50, %c20], %114 {strides = array<i32>} : memref<16x32xf32, #tpu.memory_space<vmem>>, vector<16x4xf32>,
    %116 = vector.extract_strided_slice %10 {offsets = [0, 24], sizes = [16, 4], strides = [1, 1]} : vector<16x32xf32> to vector<16x4xf32>
    %117 = vector.extract_strided_slice %18 {offsets = [0, 24], sizes = [16, 4], strides = [1, 1]} : vector<16x32xf32> to vector<16x4xf32>
    %118 = vector.extract_strided_slice %19 {offsets = [0, 24], sizes = [16, 4], strides = [1, 1]} : vector<16x32xf32> to vector<16x4xf32>
    %cst_51 = arith.constant dense<0.000000e+00> : vector<16x16xf32>
    %119 = tpu.matmul %116, %117, %cst_51 {dimension_numbers = #tpu.dot_dimension_numbers<[1], [1], [0], [0], [0, 0, 1, 0], [], []>} : vector<16x4xf32>, vector<16x4xf32>, vector<16x16xf32> -> vector<16x16xf32>
    %cst_52 = arith.constant dense<0xFF800000> : vector<16xf32>
    %120 = vector.multi_reduction <maximumf>, %119, %cst_52 [1] : vector<16x16xf32> to vector<16xf32>
    %121 = vector.shape_cast %120 : vector<16xf32> to vector<16x1xf32>
    %122 = vector.broadcast %121 : vector<16x1xf32> to vector<16x16xf32>
    %123 = arith.subf %119, %122 : vector<16x16xf32>
    %124 = math.exp %123 : vector<16x16xf32>
    %cst_53 = arith.constant dense<0.000000e+00> : vector<16xf32>
    %125 = vector.multi_reduction <add>, %124, %cst_53 [1] : vector<16x16xf32> to vector<16xf32>
    %126 = vector.shape_cast %125 : vector<16xf32> to vector<16x1xf32>
    %127 = tpu.reciprocal %126 : vector<16x1xf32> -> vector<16x1xf32>
    %cst_54 = arith.constant dense<0.000000e+00> : vector<16x4xf32>
    %128 = tpu.matmul %124, %118, %cst_54 {dimension_numbers = #tpu.dot_dimension_numbers<[1], [0], [0], [1], [0, 0, 1, 1], [], []>} : vector<16x16xf32>, vector<16x4xf32>, vector<16x4xf32> -> vector<16x4xf32>
    %129 = vector.broadcast %127 : vector<16x1xf32> to vector<16x4xf32>
    %130 = arith.mulf %128, %129 : vector<16x4xf32>
    %c0_55 = arith.constant 0 : index
    %c24 = arith.constant 24 : index
    %131 = vector.load %arg11[%c0_55, %c24] : memref<16x32xf32, #tpu.memory_space<vmem>>, vector<16x4xf32>
    tpu.vector_store %arg11[%c0_55, %c24], %130 {strides = array<i32>} : memref<16x32xf32, #tpu.memory_space<vmem>>, vector<16x4xf32>,
    %132 = vector.extract_strided_slice %10 {offsets = [0, 28], sizes = [16, 4], strides = [1, 1]} : vector<16x32xf32> to vector<16x4xf32>
    %133 = vector.extract_strided_slice %18 {offsets = [0, 28], sizes = [16, 4], strides = [1, 1]} : vector<16x32xf32> to vector<16x4xf32>
    %134 = vector.extract_strided_slice %19 {offsets = [0, 28], sizes = [16, 4], strides = [1, 1]} : vector<16x32xf32> to vector<16x4xf32>
    %cst_56 = arith.constant dense<0.000000e+00> : vector<16x16xf32>
    %135 = tpu.matmul %132, %133, %cst_56 {dimension_numbers = #tpu.dot_dimension_numbers<[1], [1], [0], [0], [0, 0, 1, 0], [], []>} : vector<16x4xf32>, vector<16x4xf32>, vector<16x16xf32> -> vector<16x16xf32>
    %cst_57 = arith.constant dense<0xFF800000> : vector<16xf32>
    %136 = vector.multi_reduction <maximumf>, %135, %cst_57 [1] : vector<16x16xf32> to vector<16xf32>
    %137 = vector.shape_cast %136 : vector<16xf32> to vector<16x1xf32>
    %138 = vector.broadcast %137 : vector<16x1xf32> to vector<16x16xf32>
    %139 = arith.subf %135, %138 : vector<16x16xf32>
    %140 = math.exp %139 : vector<16x16xf32>
    %cst_58 = arith.constant dense<0.000000e+00> : vector<16xf32>
    %141 = vector.multi_reduction <add>, %140, %cst_58 [1] : vector<16x16xf32> to vector<16xf32>
    %142 = vector.shape_cast %141 : vector<16xf32> to vector<16x1xf32>
    %143 = tpu.reciprocal %142 : vector<16x1xf32> -> vector<16x1xf32>
    %cst_59 = arith.constant dense<0.000000e+00> : vector<16x4xf32>
    %144 = tpu.matmul %140, %134, %cst_59 {dimension_numbers = #tpu.dot_dimension_numbers<[1], [0], [0], [1], [0, 0, 1, 1], [], []>} : vector<16x16xf32>, vector<16x4xf32>, vector<16x4xf32> -> vector<16x4xf32>
    %145 = vector.broadcast %143 : vector<16x1xf32> to vector<16x4xf32>
    %146 = arith.mulf %144, %145 : vector<16x4xf32>
    %c0_60 = arith.constant 0 : index
    %c28 = arith.constant 28 : index
    %147 = vector.load %arg11[%c0_60, %c28] : memref<16x32xf32, #tpu.memory_space<vmem>>, vector<16x4xf32>
    tpu.vector_store %arg11[%c0_60, %c28], %146 {strides = array<i32>} : memref<16x32xf32, #tpu.memory_space<vmem>>, vector<16x4xf32>,
    %c0_61 = arith.constant 0 : index
    %c0_62 = arith.constant 0 : index
    %148 = vector.load %arg11[%c0_61, %c0_62] : memref<16x32xf32, #tpu.memory_space<vmem>>, vector<16x32xf32>
    %c0_63 = arith.constant 0 : index
    %c0_64 = arith.constant 0 : index
    %c0_65 = arith.constant 0 : index
    %149 = vector.load %arg8[%c0_63, %c0_64, %c0_65] : memref<1x32x32xf32, #tpu.memory_space<vmem>>, vector<1x32x32xf32>
    %150 = vector.shape_cast %149 : vector<1x32x32xf32> to vector<32x32xf32>
    %cst_66 = arith.constant dense<0.000000e+00> : vector<16x32xf32>
    %151 = tpu.matmul %148, %150, %cst_66 {dimension_numbers = #tpu.dot_dimension_numbers<[1], [0], [0], [1], [0, 0, 1, 1], [], []>} : vector<16x32xf32>, vector<32x32xf32>, vector<16x32xf32> -> vector<16x32xf32>
    %c0_67 = arith.constant 0 : index
    %c0_68 = arith.constant 0 : index
    %c0_69 = arith.constant 0 : index
    %152 = vector.load %arg9[%c0_67, %c0_68, %c0_69] : memref<1x1x32xf32, #tpu.memory_space<vmem>>, vector<1x1x32xf32>
    %153 = vector.shape_cast %152 : vector<1x1x32xf32> to vector<1x32xf32>
    %154 = vector.broadcast %153 : vector<1x32xf32> to vector<16x32xf32>
    %155 = arith.addf %151, %154 : vector<16x32xf32>
    %c0_70 = arith.constant 0 : index
    %c0_71 = arith.constant 0 : index
    %c0_72 = arith.constant 0 : index
    %c0_73 = arith.constant 0 : index
    %156 = vector.load %arg10[%c0_70, %c0_71, %c0_72, %c0_73] : memref<1x1x16x32xf32, #tpu.memory_space<vmem>>, vector<1x1x16x32xf32>
    %157 = vector.shape_cast %156 : vector<1x1x16x32xf32> to vector<16x32xf32>
    %158 = vector.shape_cast %155 : vector<16x32xf32> to vector<1x1x16x32xf32>
    tpu.vector_store %arg10[%c0_70, %c0_71, %c0_72, %c0_73], %158 {strides = array<i32>} : memref<1x1x16x32xf32, #tpu.memory_space<vmem>>, vector<1x1x16x32xf32>,
    return
  }
  func.func @transform_0(%arg0: i32, %arg1: i32) -> (i32, i32, i32, i32) {
    %c0_i32 = arith.constant 0 : i32
    %c0_i32_0 = arith.constant 0 : i32
    %c0_i32_1 = arith.constant 0 : i32
    return %arg0, %arg1, %c0_i32, %c0_i32_0 : i32, i32, i32, i32
  }
  func.func @transform_1(%arg0: i32, %arg1: i32) -> (i32, i32, i32, i32) {
    %c1_i32 = arith.constant 1 : i32
    %0 = arith.subi %c1_i32, %arg0 : i32
    %c0_i32 = arith.constant 0 : i32
    %c0_i32_0 = arith.constant 0 : i32
    %c0_i32_1 = arith.constant 0 : i32
    return %0, %arg1, %c0_i32, %c0_i32_0 : i32, i32, i32, i32
  }
  func.func @transform_2(%arg0: i32, %arg1: i32) -> (i32, i32, i32) {
    %c0_i32 = arith.constant 0 : i32
    %c0_i32_0 = arith.constant 0 : i32
    %c0_i32_1 = arith.constant 0 : i32
    return %arg0, %c0_i32, %c0_i32_0 : i32, i32, i32
  }
  func.func @transform_3(%arg0: i32, %arg1: i32) -> (i32, i32, i32) {
    %c0_i32 = arith.constant 0 : i32
    %c0_i32_0 = arith.constant 0 : i32
    %c0_i32_1 = arith.constant 0 : i32
    return %arg0, %c0_i32, %c0_i32_0 : i32, i32, i32
  }
  func.func @transform_4(%arg0: i32, %arg1: i32) -> (i32, i32, i32) {
    %c0_i32 = arith.constant 0 : i32
    %c0_i32_0 = arith.constant 0 : i32
    %c0_i32_1 = arith.constant 0 : i32
    return %arg0, %c0_i32, %c0_i32_0 : i32, i32, i32
  }
  func.func @transform_5(%arg0: i32, %arg1: i32) -> (i32, i32, i32) {
    %c0_i32 = arith.constant 0 : i32
    %c0_i32_0 = arith.constant 0 : i32
    %c0_i32_1 = arith.constant 0 : i32
    return %arg0, %c0_i32, %c0_i32_0 : i32, i32, i32
  }
  func.func @transform_6(%arg0: i32, %arg1: i32) -> (i32, i32, i32) {
    %c0_i32 = arith.constant 0 : i32
    %c0_i32_0 = arith.constant 0 : i32
    %c0_i32_1 = arith.constant 0 : i32
    return %arg0, %c0_i32, %c0_i32_0 : i32, i32, i32
  }
  func.func @transform_7(%arg0: i32, %arg1: i32) -> (i32, i32, i32) {
    %c0_i32 = arith.constant 0 : i32
    %c0_i32_0 = arith.constant 0 : i32
    %c0_i32_1 = arith.constant 0 : i32
    return %arg0, %c0_i32, %c0_i32_0 : i32, i32, i32
  }
  func.func @transform_8(%arg0: i32, %arg1: i32) -> (i32, i32, i32, i32) {
    %c0_i32 = arith.constant 0 : i32
    %c0_i32_0 = arith.constant 0 : i32
    %c0_i32_1 = arith.constant 0 : i32
    return %arg0, %arg1, %c0_i32, %c0_i32_0 : i32, i32, i32, i32
  }
}

</mosaic_0001>

<bundles_post_ra>
// kernel: mutual_attention_forward.1
= control target key start
LH: loop header
LB: loop body
LE: loop exit
PB: predicated region body
PF: predicated region fallthrough
CT: control target
= control target key end

     0   :  { %13 = vsyncpa [#allocation4], 0  ;;  %s3919_s0 = inlined_call_operand.vmem [shape: f32[2,2,16,32], index: 0, kind: input, shape index: {}, may-alias: {0,1}]   ;;  %s3920_s1 = inlined_call_operand.vmem [shape: f32[2,2,16,32], index: 1, kind: input, shape index: {}, may-alias: {0,1}]   ;;  %s3921_s2 = inlined_call_operand.vmem [shape: f32[2,32,32], index: 2, kind: input, shape index: {}]   ;;  %s3922_s3 = inlined_call_operand.vmem [shape: f32[2,1,32], index: 3, kind: input, shape index: {}]   ;;  %s3923_s4 = inlined_call_operand.vmem [shape: f32[2,32,64], index: 4, kind: input, shape index: {}]   ;;  %s3924_s5 = inlined_call_operand.vmem [shape: f32[2,1,64], index: 5, kind: input, shape index: {}]   ;;  %s3925_s6 = inlined_call_operand.hbm [shape: f32[2,32,32], index: 6, kind: input, shape index: {}]   ;;  %s3926_s7 = inlined_call_operand.vmem [shape: f32[2,1,32], index: 7, kind: input, shape index: {}]   ;;  %s3927_s8 = inlined_call_operand.vmem [shape: f32[2,2,16,32], index: 8, kind: output, shape index: {}]  }
   0x1   :  { %15 = vsyncpa [#allocation4 + $0x1], 0  ;;  %s3475_s27 = smov 0   ;;  %s3477_s28 = smov 0  }
   0x2   :  { %s3479_s29 = smov 0   ;;  %s3481_s30 = smov 0  }
   0x3   :  { %s3483_s9 = smov 0   ;;  %s3485_s10 = smov 0  }
   0x4   :  { %s3487_s11 = smov 0   ;;  %s3489_s12 = smov 0  }
   0x5 LB: > { %s2658_s13 = sadd.s32 4294967295, %s3403_s12   ;;  %s30_s14 = sadd.s32 1, %s3395_s10  ;;  %s3403_s12 = sphi %s3489_s12, %s21_s12   ;;  %s3399_s11 = sphi %s3487_s11, %s3942_s11   ;;  %s3395_s10 = sphi %s3485_s10, %s3941_s10   ;;  %s3391_s9 = sphi %s3483_s9, %s3940_s9   ;;  %s3387_s30 = sphi %s3481_s30, %s3939_s30   ;;  %s3383_s29 = sphi %s3479_s29, %s3938_s29   ;;  %s3379_s28 = sphi %s3477_s28, %s3937_s28   ;;  %s3375_s27 = sphi %s3475_s27, %s3936_s27  }
   0x6   : > { %p31_p0 = scmp.ge.s32.totalorder %s30_s14, 2  ;;  %s33_s15 = sadd.s32 1, %s3399_s11 }
   0x7   : > { %s202_s16 = sadd.s32 1, %s3383_s29  ;;  %p209_p1 = scmp.ne.s32.totalorder %s3383_s29, %s3379_s28 }
   0x8   : > { %s3944_s14 = smov (%p31_p0, %s30_s14), 0  ;;  %s3946_s15 = smov (!%p31_p0, %s33_s15), %s3399_s11 }
   0x9   : > { %p210_p2 = scmp.eq.s32.totalorder %s3403_s12, 0  ;;  %p215_p3 = scmp.ne.s32.totalorder %s3379_s28, %s3375_s27 }
   0xa   : > { %p35_p4 = scmp.ge.s32.totalorder %s3946_s15, 2  ;;  %p216_p5 = scmp.eq.s32.totalorder %s2658_s13, 0 }
   0xb   : > { %p3524_p6 = por %p210_p2, %p209_p1  ;;  %p3079_p8 = scmp.lt.s32.totalorder %s3403_s12, 4 }
   0xc   : > { %s3948_s15 = smov (%p35_p4, %s3946_s15), 0  ;;  %p3530_p7 = por %p216_p5, %p215_p3 }
   0xd   : > { %3930 = sst [smem:[#allocation6_spill]] %s3948_s15  ;;  %s199_s19 = ssub.s32 %s3399_s11, %s3948_s15 }
   0xe   : > { %s347_s20 = sand.u32 1, %s3383_s29   ;;  %p200_p9 = scmp.eq.s32.totalorder %s199_s19, 0 }
   0xf   : > { %s2662_s21 = sshll.u32 %s347_s20, 5  ;;  %s2739_s22 = sshll.u32 %s3399_s11, 9 }
  0x10   : > { %s3540_s23 = scalar_select %p200_p9, %s3383_s29, %s202_s16  }
  0x11   : > { %s3545_s26 = scalar_lea.hbm %s3925_s6, %s2739_s22  ;;  %s351_s27 = scalar_lea.vmem [#allocation3], %s2662_s21 }
  0x12   : > { %s358_s13 = sshll.u32 %s351_s27, 4  ;;  %p3549_p10 = pnand %p3079_p8, %p3524_p6  ;;  %s3553_s13 = int_to_ptr.vmem [resolvable:$true] %s358_s13 }
  0x13   : > { %s3555_s16 = scalar_lea.sflag [#allocation4], %s347_s20  ;;  %s3307_s19 = scalar_lea.hbm %s3545_s26, 512 }
  0x14   : > { %p3308_p11 = scmp.ne.s32.totalorder %s3545_s26, %s3307_s19  ;;  %p3309_p12 = pneg %p3549_p10 }
  0x15   : > { %s3312_s22 = scalar_lea.hbm %s3925_s6, 1024  ;;  %p3313_p1 = scmp.lt.u32.totalorder %s3545_s26, %s3925_s6 }
  0x16   : > { %p3310_p13 = pnand %p3309_p12, %p3308_p11  ;;  %p3314_p2 = scmp.lt.u32.totalorder %s3312_s22, %s3307_s19 }
  0x17   : > { %p3316_p4 = scmp.lt.u32.totalorder %s3307_s19, %s3545_s26 }
  0x18   : > { %p3311_p0 = pneg %p3310_p13  ;;  %p3315_p3 = por %p3314_p2, %p3313_p1 }
  0x1a   : > { %p3317_p5 = por %p3316_p4, %p3315_p3 }
  0x1c   : > { %p3318_p6 = pnand %p3317_p5, %p3311_p0 }
  0x1e   : > { %3321 = shalt.err (!%p3318_p6)
}
  0x1f   : > { %s3322_s20 = scalar_lea.vmem %s3553_s13, 512  ;;  %s3405_s27 = smov [#allocation3]  }
  0x20   : > { %p3323_p8 = scmp.ne.s32.totalorder %s3553_s13, %s3322_s20  ;;  %s3327_s21 = sshll.u32 %s3405_s27, 4  ;;  %s3328_s21 = int_to_ptr.vmem [resolvable:$false] %s3327_s21 }
  0x21   : > { %s3329_s17 = scalar_lea.vmem %s3328_s21, 1024  ;;  %p3330_p13 = scmp.lt.s32.totalorder %s3553_s13, %s3328_s21 }
  0x22   : > { %p3325_p9 = pnand %p3323_p8, %p3309_p12  ;;  %p3331_p1 = scmp.lt.s32.totalorder %s3329_s17, %s3322_s20 }
  0x24   : > { %p3326_p11 = pneg %p3325_p9  ;;  %p3332_p2 = por %p3331_p1, %p3330_p13 }
  0x26   : > { %p3333_p3 = pnand %p3332_p2, %p3326_p11 }
  0x28   : > { %3336 = shalt.err (!%p3333_p3)
}
  0x29   : > { %s3406_s19 = smov 128   ;;  %s3407_s22 = smov 8  }
  0x2a   : > { %3078 = dma.hbm_to_vmem [thread:$0]  (!%p3549_p10), %s3545_s26, 512, %s3553_s13, %s3555_s16, %s3406_s19, %s3406_s19, %s3407_s22  }
  0x2b   : > { %p2665_p12 = scmp.ge.s32.totalorder %s3403_s12, 1  ;;  %p372_p0 = scmp.lt.s32.totalorder %s3403_s12, 5 }
  0x2d   : > { %p373_p4 = pnand %p2665_p12, %p372_p0 }
  0x2e   : > { %s378_s24 = sand.u32 (!%p373_p4), 1, %s3379_s28  }
  0x2f   : > { %376 = sbr.rel (%p373_p4) target bundleno = 3515 (0xdbb), region = 52  ;;  %s2666_s25 = sshll.u32 (!%p373_p4), %s378_s24, 5 }
  0x30   : > { %s379_s20 = scalar_lea.sflag (!%p373_p4), [#allocation4], %s378_s24  ;;  %s3586_s27 = scalar_lea.vmem (!%p373_p4), [#allocation3], %s2666_s25 }
  0x36   : > { %3370 = dma.done.wait (%p3530_p7), %s379_s20, 512  }
  0x37   : > { %3372 = vsyncadd (%p3530_p7), %s379_s20, 4294966784  ;;  %p457_p10 = scmp.lt.s32.totalorder %s3391_s9, 1  ;;  %p459_p5 = scmp.lt.s32.totalorder %s3387_s30, 1  ;;  %vm520_vm0 = vcmask 261120   ;;  %vm694_vm1 = vcmask 31744   ;;  %vm782_vm3 = vcmask 130048  }
  0x38   : > { %s466_s15 = ssub.s32 1, %s3391_s9  ;;  %vm3632_vm2 = vmpackc.low %vm694_vm1, %vm694_vm1  ;;  %s3410_s17 = smov 120   ;;  %vm1102_vm4 = vcmask 64544   ;;  %vm1313_vm5 = vcmask 97344   ;;  %vm1524_vm6 = vcmask 130144   ;;  %vm1735_vm7 = vcmask 162944  }
  0x39   : > { %s3950_s9 = smov (!%p457_p10, %s3391_s9), 1  ;;  %s3952_s30 = smov (!%p459_p5, %s3387_s30), 1  ;;  %vm1946_vm8 = vcmask 195744   ;;  %vm2157_vm9 = vcmask 228544   ;;  %vm2368_vm10 = vcmask 261344  }
  0x3a   : > { %s2740_s26 = sshll.u32 %s3950_s9, 5  ;;  %p467_p6 = scmp.lt.s32.totalorder %s466_s15, 1 }
  0x3b   : > { %s489_s18 = scalar_lea.vmem %s3923_s4, %s2740_s26  ;;  %s2667_s21 = sshll.u32 %s3952_s30, 1 }
  0x3c   : > { %s3954_s15 = smov (!%p467_p6, %s466_s15), 1  ;;  %v602_v0 = vld [vmem:[%s489_s18] sm:$0xff]  ;;  %v603_v1 = vld [vmem:[%s489_s18 + $0x8] sm:$0xff]  ;;  %v604_v2 = vld [vmem:[%s489_s18 + $0x10] sm:$0xff]  ;;  %s481_s22 = scalar_lea.vmem %s3921_s2, %s2740_s26 }
  0x3d   : > { %s2668_s24 = sshll.u32 %s3950_s9, 2  ;;  %v2977_v3 = vpack.c.bf16 %v603_v1, %v602_v0  ;;  %v605_v4 = vld [vmem:[%s489_s18 + $0x18] sm:$0xff]  ;;  %s2671_s25 = sshll.u32 %s3954_s15, 2  ;;  %v509_v5 = vld [vmem:[%s481_s22] sm:$0xff]  ;;  %v510_v6 = vld [vmem:[%s481_s22 + $0x8] sm:$0xff] }
  0x3e   : > { %s3607_s20 = sadd.s32 %s2668_s24, %s2667_s21  ;;  %v2981_v7 = vpack.c.bf16 %v605_v4, %v604_v2  ;;  %s473_s30 = sadd.s32 %s2671_s25, %s2667_s21  ;;  %v2969_v8 = vpack.c.bf16 %v510_v6, %v509_v5  ;;  %v511_v9 = vld [vmem:[%s481_s22 + $0x10] sm:$0xff]  ;;  %v512_v10 = vld [vmem:[%s481_s22 + $0x18] sm:$0xff] }
  0x3f   : > { %s2669_s13 = sshll.u32 %s3607_s20, 3  ;;  %2978 = vmatprep.subr.bf16.mxu1 %v2977_v3  ;;  %s2672_s16 = sshll.u32 %s473_s30, 3  ;;  %v2973_v11 = vpack.c.bf16 %v512_v10, %v511_v9 }
  0x40   : > { %s465_s15 = scalar_lea.vmem %s3919_s0, %s2669_s13  ;;  %2980 = vmatpush3.bf16.msra.mxu1 %v2977_v3  ;;  %s475_s24 = scalar_lea.vmem %s3920_s1, %s2672_s16  ;;  %2970 = vmatprep.subr.bf16.mxu0 %v2969_v8 }
  0x41   : > { %v505_v12 = vld [vmem:[%s465_s15] sm:$0xff]  ;;  %2982 = vmatprep.subr.bf16.mxu1 %v2981_v7  ;;  %2972 = vmatpush3.bf16.msra.mxu0 %v2969_v8  ;;  %v508_v14 = vld [vmem:[%s475_s24 + $0x8] sm:$0xff]  ;;  %s492_s25 = scalar_lea.vmem %s3924_s5, %s3950_s9  ;;  %s484_s26 = scalar_lea.vmem %s3922_s3, %s3950_s9 }
  0x42   : > { %v507_v13 = vld [vmem:[%s475_s24] sm:$0xff]  ;;  %2974 = vmatprep.subr.bf16.mxu0 %v2973_v11  ;;  %2832 = vmatprep.mubr.msk.f32.mxu0 %vm520_vm0, %v505_v12  ;;  %v506_v15 = vld [vmem:[%s465_s15 + $0x8] sm:$0xff]  ;;  %s3408_s18 = smov 96   ;;  %s3409_s15 = smov 124  }
  0x43   : > { %2843 = vmatprep.mubr.msk.f32.mxu1 %vm520_vm0, %v507_v13  ;;  %v2683_v16 = vld [vmem:[%s492_s25] ss:$0 sm:$0xff]  ;;  %s3411_s19 = smov 92   ;;  %s3412_s24 = smov 116  }
  0x44   : > { %2984 = vmatpush3.bf16.msra.mxu1 %v2981_v7  ;;  %v2680_v18 = vld [vmem:[%s484_s26] ss:$0 sm:$0xff]  ;;  %s3413_s21 = smov 88   ;;  %s3414_s22 = smov 112  }
  0x45   : > { %2976 = vmatpush3.bf16.msra.mxu0 %v2973_v11  ;;  %s3415_s25 = smov 84   ;;  %s3416_s30 = smov 108  }
  0x46   : > { %s3417_s16 = smov 80   ;;  %s3418_s26 = smov 104  }
  0x47   : > { %2844 = vmatmul.mubr.msk.f32.vlgmr.msra.gmra.mrb[0].mxu1 %vm520_vm0, %v508_v14 }
  0x48   : > { %2833 = vmatmul.mubr.msk.f32.vlgmr.msra.gmra.mrb[0].mxu0 %vm520_vm0, %v506_v15 }
 0x11a   : > { %v2845_v17 = vpop.f32.mrb[0].mxu1 }
 0x11b   : > { %v691_v19 = vadd.f32 %v2845_v17, %v2683_v16  ;;  %v685_v20 = vpop.f32.mrb[1].mxu1  ;;  %v2834_v21 = vpop.f32.mrb[0].mxu0 }
 0x11c   : > { %v686_v22 = vadd.f32 %v2683_v16, %v685_v20  ;;  %v593_v23 = vpop.f32.mrb[1].mxu0  ;;  %v3649_v28 = vadd.f32 %v2834_v21, %v2680_v18 }
 0x11d   : > { %v3636_v25 = vadd.f32 %v2680_v18, %v593_v23 }
 0x11e   : > { %v3638_v26 = vpack.i.bf16 %v691_v19, %v686_v22  ;;  %v2985_v27 = vpack.c.bf16 %v691_v19, %v686_v22 }
 0x11f   : > { %2850 = vmatprep.mubr.msk.f32.mxu0 %vm694_vm1, %v3636_v25 }
 0x120   : > { %3169 = vrot.lane.b32.xlu1 %v3638_v26, %s3408_s18  ;;  %2987 = vmatprep.subr.msk.bf16.mxu0 %vm3632_vm2, %v2985_v27  ;;  %s3419_s18 = smov 76  }
 0x121   : > { %2990 = vmatpush3.bf16.xpose.msk.msra.mxu0 %vm3632_vm2, %v2985_v27 }
 0x124   : > { %3174 = vrot.lane.b32.xlu1 %v3638_v26, %s3409_s15 }
 0x128   : > { %3179 = vrot.lane.b32.xlu1 %v3638_v26, %s3410_s17  ;;  %2851 = vmatmul.mubr.msk.f32.vlgmr.msra.gmra.mrb[2].mxu0 %vm694_vm1, %v3649_v28 }
 0x12c   : > { %896 = vrot.lane.b32.xlu1 %v3649_v28, %s3409_s15 }
 0x130   : > { %1105 = vrot.lane.b32.xlu1 %v3636_v25, %s3410_s17 }
 0x134   : > { %1107 = vrot.lane.b32.xlu1 %v3649_v28, %s3410_s17  ;;  %s3421_s17 = smov 72  }
 0x138   : > { %3184 = vrot.lane.b32.xlu1 %v3638_v26, %s3411_s19  ;;  %s3422_s19 = smov 68  }
 0x192   : > { %v3170_v29 = vpop.permute.xlu1 %3169 }
 0x193   : > { %v3172_v30 = vunpack.i.h.bf16 %v3170_v29  ;;  %v3171_v31 = vunpack.i.l.bf16 %v3170_v29 }
 0x195   : > { %v2991_v32 = vpack.c.bf16 %v3172_v30, %v3171_v31 }
 0x196   : > { %v3175_v33 = vpop.permute.xlu1 %3174 }
 0x197   : > { %v3177_v34 = vunpack.i.h.bf16 %v3175_v33  ;;  %v3176_v35 = vunpack.i.l.bf16 %v3175_v33  ;;  %2992 = vmatprep.subr.bf16.mxu1 %v2991_v32 }
 0x198   : > { %2994 = vmatpush3.bf16.msra.mxu1 %v2991_v32 }
 0x199   : > { %v2995_v36 = vpack.c.bf16 %v3177_v34, %v3176_v35 }
 0x19a   : > { %v3180_v37 = vpop.permute.xlu1 %3179 }
 0x19b   : > { %v3182_v38 = vunpack.i.h.bf16 %v3180_v37  ;;  %v3181_v39 = vunpack.i.l.bf16 %v3180_v37  ;;  %2997 = vmatprep.subr.msk.bf16.mxu1 %vm3632_vm2, %v2995_v36 }
 0x19d   : > { %v3005_v40 = vpack.c.bf16 %v3182_v38, %v3181_v39 }
 0x19e   : > { %v897_v41 = vpop.permute.xlu1 %896 }
 0x19f   : > { %3007 = vmatprep.subr.msk.bf16.mxu0 %vm3632_vm2, %v3005_v40 }
 0x1a0   : > { %3010 = vmatpush3.bf16.xpose.msk.msra.mxu0 %vm3632_vm2, %v3005_v40 }
 0x1a2   : > { %v1106_v42 = vpop.permute.xlu1 %1105 }
 0x1a3   : > { %2878 = vmatprep.mubr.msk.f32.mxu0 %vm694_vm1, %v1106_v42 }
 0x1a6   : > { %v1108_v43 = vpop.permute.xlu1 %1107 }
 0x1a7   : > { %2879 = vmatmul.mubr.msk.f32.vlgmr.msra.gmra.mrb[4].mxu0 %vm694_vm1, %v1108_v43 }
 0x1aa   : > { %v3185_v58 = vpop.permute.xlu1 %3184 }
 0x1ab   : > { %v3187_v60 = vunpack.i.h.bf16 %v3185_v58  ;;  %v3186_v61 = vunpack.i.l.bf16 %v3185_v58 }
 0x1ad   : > { %v3001_v63 = vpack.c.bf16 %v3187_v60, %v3186_v61 }
 0x1fb   : > { %v2852_v44 = vpop.f32.mrb[2].mxu0 }
 0x1fc   : > { %v773_v45 = vpop.f32.mrb[3].mxu0  ;;  %v786_v47 = vsel %vm782_vm3, %v2852_v44, -inf }
 0x1fd   : > { %v783_v46 = vsel %vm782_vm3, %v773_v45, -inf }
 0x1fe   : > { %784 = vmax.xlane.f32.xlu0 %v783_v46 }
 0x202   : > { %787 = vmax.xlane.f32.xlu0 %v786_v47 }
 0x218   : > { %894 = vrot.lane.b32.xlu0 %v3636_v25, %s3409_s15  ;;  %s3420_s15 = smov 100  }
 0x27a   : > { %v2880_v48 = vpop.f32.mrb[4].mxu0 }
 0x27b   : > { %v1187_v49 = vpop.f32.mrb[5].mxu0  ;;  %v1199_v50 = vsel %vm782_vm3, %v2880_v48, -inf }
 0x27c   : > { %1200 = vmax.xlane.f32.xlu0 %v1199_v50  ;;  %v1196_v51 = vsel %vm782_vm3, %v1187_v49, -inf }
 0x27d   : > { %1197 = vmax.xlane.f32.xlu1 %v1196_v51 }
 0x28b   : > { %v785_v52 = vpop.xlane.xlu0 %784 }
 0x28c   : > { %v789_v53 = vsub.f32 %v773_v45, %v785_v52 }
 0x28e   : > { %v791_v54 = vmul.f32 1.442695, %v789_v53 }
 0x28f   : > { %v788_v55 = vpop.xlane.xlu0 %787 }
 0x290   : > { %3243 = vpow2.f32 %v791_v54  ;;  %v790_v56 = vsub.f32 %v2852_v44, %v788_v55 }
 0x292   : > { %v793_v57 = vmul.f32 1.442695, %v790_v56 }
 0x293   : > { %v895_v0 = vpop.permute.xlu0 %894 }
 0x294   : > { %3245 = vpow2.f32 %v793_v57 }
 0x29a   : > { %v3673_v59 = vpop.eup %3243 }
 0x29b   : > { %2857 = vmatprep.mubr.msk.f32.mxu1 %vm782_vm3, %v3673_v59 }
 0x29e   : > { %v3677_v62 = vpop.eup %3245 }
 0x29f   : > { %2858 = vmatmul.mubr.msk.f32.vlgmr.msra.gmra.mrb[2].mxu1 %vm782_vm3, %v3677_v62 }
 0x2a0   : > { %3000 = vmatpush3.bf16.xpose.msk.msra.mxu1 %vm3632_vm2, %v2995_v36  ;;  %2864 = vmatprep.mubr.msk.f32.mxu1 %vm694_vm1, %v895_v0 }
 0x2a1   : > { %3002 = vmatprep.subr.bf16.mxu1 %v3001_v63 }
 0x2a7   : > { %2865 = vmatmul.mubr.msk.f32.vlgmr.msra.gmra.mrb[4].mxu1 %vm694_vm1, %v897_v41 }
 0x2a8   : > { %3004 = vmatpush3.bf16.msra.mxu1 %v3001_v63 }
 0x309   : > { %v1201_v7 = vpop.xlane.xlu0 %1200 }
 0x30a   : > { %v1198_v8 = vpop.xlane.xlu1 %1197  ;;  %v1203_v14 = vsub.f32 %v2880_v48, %v1201_v7 }
 0x30b   : > { %v1202_v9 = vsub.f32 %v1187_v49, %v1198_v8 }
 0x30c   : > { %v1206_v21 = vmul.f32 1.442695, %v1203_v14 }
 0x30d   : > { %v1204_v16 = vmul.f32 1.442695, %v1202_v9 }
 0x372   : > { %v3685_v1 = vpop.f32.mrb[2].mxu1 }
 0x373   : > { %v3687_v2 = vpop.f32.mrb[3].mxu1 }
 0x37a   : > { %v2866_v3 = vpop.f32.mrb[4].mxu1 }
 0x37b   : > { %v976_v4 = vpop.f32.mrb[5].mxu1  ;;  %v988_v5 = vsel %vm782_vm3, %v2866_v3, -inf }
 0x37c   : > { %989 = vmax.xlane.f32.xlu0 %v988_v5  ;;  %v985_v6 = vsel %vm782_vm3, %v976_v4, -inf }
 0x37d   : > { %986 = vmax.xlane.f32.xlu1 %v985_v6 }
 0x38e   : > { %3194 = vrot.lane.b32.xlu1 %v3638_v26, %s3412_s24 }
 0x392   : > { %3189 = vrot.lane.b32.xlu0 %v3638_v26, %s3413_s21  ;;  %1316 = vrot.lane.b32.xlu1 %v3636_v25, %s3412_s24  ;;  %s3424_s21 = smov 8  }
 0x396   : > { %1318 = vrot.lane.b32.xlu0 %v3649_v28, %s3412_s24  ;;  %3204 = vrot.lane.b32.xlu1 %v3638_v26, %s3414_s22  ;;  %s3423_s24 = smov 4  }
 0x409   : > { %v990_v10 = vpop.xlane.xlu0 %989 }
 0x40a   : > { %v992_v11 = vsub.f32 %v2866_v3, %v990_v10  ;;  %v987_v12 = vpop.xlane.xlu1 %986 }
 0x40b   : > { %v991_v13 = vsub.f32 %v976_v4, %v987_v12 }
 0x40c   : > { %v995_v15 = vmul.f32 1.442695, %v992_v11 }
 0x40d   : > { %v993_v17 = vmul.f32 1.442695, %v991_v13  ;;  %v3190_v18 = vpop.permute.xlu0 %3189 }
 0x40e   : > { %v3192_v19 = vunpack.i.h.bf16 %v3190_v18  ;;  %v3191_v20 = vunpack.i.l.bf16 %v3190_v18  ;;  %v3195_v23 = vpop.permute.xlu1 %3194 }
 0x40f   : > { %3247 = vpow2.f32 %v993_v17  ;;  %v3197_v27 = vunpack.i.h.bf16 %v3195_v23  ;;  %v3196_v29 = vunpack.i.l.bf16 %v3195_v23 }
 0x410   : > { %3249 = vpow2.f32 %v995_v15  ;;  %v3011_v22 = vpack.c.bf16 %v3192_v19, %v3191_v20 }
 0x411   : > { %3251 = vpow2.f32 %v1204_v16  ;;  %v3015_v33 = vpack.c.bf16 %v3197_v27, %v3196_v29  ;;  %v1319_v36 = vpop.permute.xlu0 %1318 }
 0x412   : > { %3012 = vmatprep.subr.bf16.mxu1 %v3011_v22  ;;  %3253 = vpow2.f32 %v1206_v21  ;;  %v1317_v35 = vpop.permute.xlu1 %1316 }
 0x416   : > { %v3205_v45 = vpop.permute.xlu1 %3204 }
 0x417   : > { %v3207_v53 = vunpack.i.h.bf16 %v3205_v45  ;;  %v3206_v54 = vunpack.i.l.bf16 %v3205_v45 }
 0x419   : > { %v3697_v30 = vpop.eup %3247  ;;  %v3025_v58 = vpack.c.bf16 %v3207_v53, %v3206_v54 }
 0x41a   : > { %v3699_v31 = vpop.eup %3249  ;;  %2871 = vmatprep.mubr.msk.f32.mxu1 %vm782_vm3, %v3697_v30  ;;  %v997_v24 = vsel %vm782_vm3, %v3697_v30, 0.0 }
 0x41b   : > { %v3703_v32 = vpop.eup %3251  ;;  %2872 = vmatmul.mubr.msk.f32.vlgmr.msra.gmra.mrb[6].mxu1 %vm782_vm3, %v3699_v31 }
 0x41c   : > { %3014 = vmatpush3.bf16.msra.mxu1 %v3011_v22  ;;  %2885 = vmatprep.mubr.msk.f32.mxu1 %vm782_vm3, %v3703_v32  ;;  %v3711_v34 = vpop.eup %3253 }
 0x41d   : > { %3017 = vmatprep.subr.msk.bf16.mxu1 %vm3632_vm2, %v3015_v33 }
 0x41f   : > { %2886 = vmatmul.mubr.msk.f32.vlgmr.msra.gmra.mrb[8].mxu1 %vm782_vm3, %v3711_v34 }
 0x420   : > { %2892 = vmatprep.mubr.msk.f32.mxu1 %vm694_vm1, %v1317_v35 }
 0x425   : > { %3020 = vmatpush3.bf16.xpose.msk.msra.mxu1 %vm3632_vm2, %v3015_v33 }
 0x42c   : > { %2893 = vmatmul.mubr.msk.f32.vlgmr.msra.gmra.mrb[10].mxu1 %vm694_vm1, %v1319_v36 }
 0x4ee   : > { %v3719_v37 = vpop.f32.mrb[6].mxu1 }
 0x4ef   : > { %v3721_v38 = vpop.f32.mrb[7].mxu1 }
 0x4f2   : > { %v3723_v39 = vpop.f32.mrb[8].mxu1 }
 0x4f3   : > { %v3725_v40 = vpop.f32.mrb[9].mxu1 }
 0x4ff   : > { %v2894_v41 = vpop.f32.mrb[10].mxu1 }
 0x500   : > { %v1398_v42 = vpop.f32.mrb[11].mxu1  ;;  %v1410_v43 = vsel %vm782_vm3, %v2894_v41, -inf }
 0x501   : > { %1411 = vmax.xlane.f32.xlu0 %v1410_v43  ;;  %v1407_v44 = vsel %vm782_vm3, %v1398_v42, -inf }
 0x502   : > { %1408 = vmax.xlane.f32.xlu1 %v1407_v44 }
 0x513   : > { %1527 = vrot.lane.b32.xlu1 %v3636_v25, %s3414_s22 }
 0x517   : > { %3199 = vrot.lane.b32.xlu0 %v3638_v26, %s3415_s25  ;;  %3214 = vrot.lane.b32.xlu1 %v3638_v26, %s3416_s30  ;;  %s3426_s25 = smov 16  }
 0x51b   : > { %1529 = vrot.lane.b32.xlu0 %v3649_v28, %s3414_s22  ;;  %s3425_s22 = smov 12  }
 0x58e   : > { %v1412_v46 = vpop.xlane.xlu0 %1411 }
 0x58f   : > { %v1414_v47 = vsub.f32 %v2894_v41, %v1412_v46  ;;  %v1409_v48 = vpop.xlane.xlu1 %1408 }
 0x590   : > { %v1413_v49 = vsub.f32 %v1398_v42, %v1409_v48 }
 0x591   : > { %v1417_v50 = vmul.f32 1.442695, %v1414_v47 }
 0x592   : > { %v1415_v51 = vmul.f32 1.442695, %v1413_v49  ;;  %v3200_v52 = vpop.permute.xlu0 %3199 }
 0x593   : > { %v3202_v55 = vunpack.i.h.bf16 %v3200_v52  ;;  %v3201_v56 = vunpack.i.l.bf16 %v3200_v52  ;;  %v1528_v63 = vpop.permute.xlu1 %1527 }
 0x594   : > { %3255 = vpow2.f32 %v1415_v51 }
 0x595   : > { %3257 = vpow2.f32 %v1417_v50  ;;  %v3021_v57 = vpack.c.bf16 %v3202_v55, %v3201_v56 }
 0x596   : > { %v1530_v0 = vpop.permute.xlu0 %1529 }
 0x597   : > { %3022 = vmatprep.subr.bf16.mxu0 %v3021_v57  ;;  %v3215_v9 = vpop.permute.xlu1 %3214 }
 0x598   : > { %3024 = vmatpush3.bf16.msra.mxu0 %v3021_v57  ;;  %v3217_v17 = vunpack.i.h.bf16 %v3215_v9  ;;  %v3216_v18 = vunpack.i.l.bf16 %v3215_v9 }
 0x599   : > { %3027 = vmatprep.subr.msk.bf16.mxu0 %vm3632_vm2, %v3025_v58 }
 0x59a   : > { %v3035_v22 = vpack.c.bf16 %v3217_v17, %v3216_v18 }
 0x59e   : > { %v3738_v60 = vpop.eup %3255 }
 0x59f   : > { %v3740_v61 = vpop.eup %3257  ;;  %2899 = vmatprep.mubr.msk.f32.mxu0 %vm782_vm3, %v3738_v60 }
 0x5a0   : > { %2900 = vmatmul.mubr.msk.f32.vlgmr.msra.gmra.mrb[6].mxu0 %vm782_vm3, %v3740_v61 }
 0x5a1   : > { %3030 = vmatpush3.bf16.xpose.msk.msra.mxu0 %vm3632_vm2, %v3025_v58  ;;  %2906 = vmatprep.mubr.msk.f32.mxu0 %vm694_vm1, %v1528_v63 }
 0x5a8   : > { %2907 = vmatmul.mubr.msk.f32.vlgmr.msra.gmra.mrb[8].mxu0 %vm694_vm1, %v1530_v0 }
 0x673   : > { %v3750_v3 = vpop.f32.mrb[6].mxu0 }
 0x674   : > { %v3752_v4 = vpop.f32.mrb[7].mxu0 }
 0x67b   : > { %v2908_v5 = vpop.f32.mrb[8].mxu0 }
 0x67c   : > { %v1609_v6 = vpop.f32.mrb[9].mxu0  ;;  %v1621_v7 = vsel %vm782_vm3, %v2908_v5, -inf }
 0x67d   : > { %1622 = vmax.xlane.f32.xlu0 %v1621_v7  ;;  %v1618_v8 = vsel %vm782_vm3, %v1609_v6, -inf }
 0x67e   : > { %1619 = vmax.xlane.f32.xlu1 %v1618_v8 }
 0x68f   : > { %1738 = vrot.lane.b32.xlu1 %v3636_v25, %s3416_s30 }
 0x693   : > { %3209 = vrot.lane.b32.xlu0 %v3638_v26, %s3417_s16  ;;  %3224 = vrot.lane.b32.xlu1 %v3638_v26, %s3418_s26  ;;  %s3428_s16 = smov 24  }
 0x697   : > { %1740 = vrot.lane.b32.xlu0 %v3649_v28, %s3416_s30  ;;  %s3427_s30 = smov 20  }
 0x70a   : > { %v1623_v10 = vpop.xlane.xlu0 %1622 }
 0x70b   : > { %v1625_v11 = vsub.f32 %v2908_v5, %v1623_v10  ;;  %v1620_v12 = vpop.xlane.xlu1 %1619 }
 0x70c   : > { %v1624_v13 = vsub.f32 %v1609_v6, %v1620_v12 }
 0x70d   : > { %v1628_v14 = vmul.f32 1.442695, %v1625_v11 }
 0x70e   : > { %v1626_v15 = vmul.f32 1.442695, %v1624_v13  ;;  %v3210_v16 = vpop.permute.xlu0 %3209 }
 0x70f   : > { %v3212_v19 = vunpack.i.h.bf16 %v3210_v16  ;;  %v3211_v20 = vunpack.i.l.bf16 %v3210_v16  ;;  %v1739_v29 = vpop.permute.xlu1 %1738 }
 0x710   : > { %3259 = vpow2.f32 %v1626_v15 }
 0x711   : > { %3261 = vpow2.f32 %v1628_v14  ;;  %v3031_v21 = vpack.c.bf16 %v3212_v19, %v3211_v20 }
 0x712   : > { %v1741_v33 = vpop.permute.xlu0 %1740 }
 0x713   : > { %3032 = vmatprep.subr.bf16.mxu1 %v3031_v21  ;;  %v3225_v45 = vpop.permute.xlu1 %3224 }
 0x714   : > { %3034 = vmatpush3.bf16.msra.mxu1 %v3031_v21  ;;  %v3227_v53 = vunpack.i.h.bf16 %v3225_v45  ;;  %v3226_v54 = vunpack.i.l.bf16 %v3225_v45 }
 0x715   : > { %3037 = vmatprep.subr.msk.bf16.mxu1 %vm3632_vm2, %v3035_v22 }
 0x716   : > { %v3045_v58 = vpack.c.bf16 %v3227_v53, %v3226_v54  ;;  %v1211_v53 = vsel %vm782_vm3, %v3711_v34, 0.0  ;;  %v1419_v54 = vsel %vm782_vm3, %v3738_v60, 0.0 }
 0x71a   : > { %v3765_v23 = vpop.eup %3259 }
 0x71b   : > { %v3767_v27 = vpop.eup %3261  ;;  %2913 = vmatprep.mubr.msk.f32.mxu1 %vm782_vm3, %v3765_v23  ;;  %v1630_v30 = vsel %vm782_vm3, %v3765_v23, 0.0  ;;  %v1422_v23 = vsel %vm782_vm3, %v3740_v61, 0.0 }
 0x71c   : > { %2914 = vmatmul.mubr.msk.f32.vlgmr.msra.gmra.mrb[12].mxu1 %vm782_vm3, %v3767_v27 }
 0x71d   : > { %3040 = vmatpush3.bf16.xpose.msk.msra.mxu1 %vm3632_vm2, %v3035_v22  ;;  %2920 = vmatprep.mubr.msk.f32.mxu1 %vm694_vm1, %v1739_v29 }
 0x724   : > { %2921 = vmatmul.mubr.msk.f32.vlgmr.msra.gmra.mrb[14].mxu1 %vm694_vm1, %v1741_v33 }
 0x7ef   : > { %v3777_v35 = vpop.f32.mrb[12].mxu1 }
 0x7f0   : > { %v3779_v36 = vpop.f32.mrb[13].mxu1 }
 0x7f7   : > { %v2922_v41 = vpop.f32.mrb[14].mxu1 }
 0x7f8   : > { %v1820_v42 = vpop.f32.mrb[15].mxu1  ;;  %v1832_v43 = vsel %vm782_vm3, %v2922_v41, -inf }
 0x7f9   : > { %1833 = vmax.xlane.f32.xlu0 %v1832_v43  ;;  %v1829_v44 = vsel %vm782_vm3, %v1820_v42, -inf }
 0x7fa   : > { %1830 = vmax.xlane.f32.xlu1 %v1829_v44 }
 0x80b   : > { %1949 = vrot.lane.b32.xlu1 %v3636_v25, %s3418_s26 }
 0x80f   : > { %3219 = vrot.lane.b32.xlu0 %v3638_v26, %s3419_s18  ;;  %3234 = vrot.lane.b32.xlu1 %v3638_v26, %s3420_s15 }
 0x813   : > { %1951 = vrot.lane.b32.xlu0 %v3649_v28, %s3418_s26  ;;  %s3429_s26 = smov 28  }
 0x886   : > { %v1834_v46 = vpop.xlane.xlu0 %1833 }
 0x887   : > { %v1836_v47 = vsub.f32 %v2922_v41, %v1834_v46  ;;  %v1831_v48 = vpop.xlane.xlu1 %1830 }
 0x888   : > { %v1835_v49 = vsub.f32 %v1820_v42, %v1831_v48 }
 0x889   : > { %v1839_v50 = vmul.f32 1.442695, %v1836_v47 }
 0x88a   : > { %v1837_v51 = vmul.f32 1.442695, %v1835_v49  ;;  %v3220_v52 = vpop.permute.xlu0 %3219 }
 0x88b   : > { %v3222_v55 = vunpack.i.h.bf16 %v3220_v52  ;;  %v3221_v56 = vunpack.i.l.bf16 %v3220_v52  ;;  %v1950_v5 = vpop.permute.xlu1 %1949  ;;  %v1208_v52 = vsel %vm782_vm3, %v3703_v32, 0.0 }
 0x88c   : > { %3263 = vpow2.f32 %v1837_v51  ;;  %v1000_v51 = vsel %vm782_vm3, %v3699_v31, 0.0  ;;  %v1633_v31 = vsel %vm782_vm3, %v3767_v27, 0.0  ;;  %v795_v27 = vsel %vm782_vm3, %v3673_v59, 0.0 }
 0x88d   : > { %3265 = vpow2.f32 %v1839_v50  ;;  %v3041_v57 = vpack.c.bf16 %v3222_v55, %v3221_v56 }
 0x88e   : > { %v1952_v6 = vpop.permute.xlu0 %1951 }
 0x88f   : > { %3042 = vmatprep.subr.bf16.mxu0 %v3041_v57  ;;  %v3235_v13 = vpop.permute.xlu1 %3234 }
 0x890   : > { %3044 = vmatpush3.bf16.msra.mxu0 %v3041_v57  ;;  %v3237_v21 = vunpack.i.h.bf16 %v3235_v13  ;;  %v3236_v22 = vunpack.i.l.bf16 %v3235_v13 }
 0x891   : > { %3047 = vmatprep.subr.msk.bf16.mxu0 %vm3632_vm2, %v3045_v58 }
 0x892   : > { %v3055_v41 = vpack.c.bf16 %v3237_v21, %v3236_v22  ;;  %v798_v21 = vsel %vm782_vm3, %v3677_v62, 0.0 }
 0x896   : > { %v3792_v63 = vpop.eup %3263 }
 0x897   : > { %v3794_v0 = vpop.eup %3265  ;;  %2927 = vmatprep.mubr.msk.f32.mxu0 %vm782_vm3, %v3792_v63  ;;  %v1841_v32 = vsel %vm782_vm3, %v3792_v63, 0.0 }
 0x898   : > { %2928 = vmatmul.mubr.msk.f32.vlgmr.msra.gmra.mrb[10].mxu0 %vm782_vm3, %v3794_v0  ;;  %v1844_v34 = vsel %vm782_vm3, %v3794_v0, 0.0 }
 0x899   : > { %3050 = vmatpush3.bf16.xpose.msk.msra.mxu0 %vm3632_vm2, %v3045_v58  ;;  %2934 = vmatprep.mubr.msk.f32.mxu0 %vm694_vm1, %v1950_v5 }
 0x8a0   : > { %2935 = vmatmul.mubr.msk.f32.vlgmr.msra.gmra.mrb[12].mxu0 %vm694_vm1, %v1952_v6 }
 0x96b   : > { %v3804_v7 = vpop.f32.mrb[10].mxu0 }
 0x96c   : > { %v3806_v8 = vpop.f32.mrb[11].mxu0 }
 0x973   : > { %v2936_v9 = vpop.f32.mrb[12].mxu0 }
 0x974   : > { %v2031_v10 = vpop.f32.mrb[13].mxu0  ;;  %v2043_v11 = vsel %vm782_vm3, %v2936_v9, -inf }
 0x975   : > { %2044 = vmax.xlane.f32.xlu0 %v2043_v11  ;;  %v2040_v12 = vsel %vm782_vm3, %v2031_v10, -inf }
 0x976   : > { %2041 = vmax.xlane.f32.xlu1 %v2040_v12 }
 0x987   : > { %2160 = vrot.lane.b32.xlu1 %v3636_v25, %s3420_s15 }
 0x98b   : > { %3229 = vrot.lane.b32.xlu0 %v3638_v26, %s3421_s17 }
 0x98f   : > { %2162 = vrot.lane.b32.xlu0 %v3649_v28, %s3420_s15  ;;  %s495_s15 = scalar_lea.vmem %s3926_s7, %s3950_s9 }
 0xa02   : > { %v2045_v14 = vpop.xlane.xlu0 %2044 }
 0xa03   : > { %v2047_v15 = vsub.f32 %v2936_v9, %v2045_v14  ;;  %v2042_v16 = vpop.xlane.xlu1 %2041 }
 0xa04   : > { %v2046_v17 = vsub.f32 %v2031_v10, %v2042_v16 }
 0xa05   : > { %v2050_v18 = vmul.f32 1.442695, %v2047_v15 }
 0xa06   : > { %v2048_v19 = vmul.f32 1.442695, %v2046_v17  ;;  %v3230_v20 = vpop.permute.xlu0 %3229 }
 0xa07   : > { %v3232_v29 = vunpack.i.h.bf16 %v3230_v20  ;;  %v3231_v33 = vunpack.i.l.bf16 %v3230_v20  ;;  %v2161_v43 = vpop.permute.xlu1 %2160 }
 0xa08   : > { %3267 = vpow2.f32 %v2048_v19 }
 0xa09   : > { %3269 = vpow2.f32 %v2050_v18  ;;  %v3051_v25 = vpack.c.bf16 %v3232_v29, %v3231_v33 }
 0xa0a   : > { %v2163_v44 = vpop.permute.xlu0 %2162 }
 0xa0b   : > { %3052 = vmatprep.subr.bf16.mxu1 %v3051_v25 }
 0xa0c   : > { %3054 = vmatpush3.bf16.msra.mxu1 %v3051_v25 }
 0xa0d   : > { %3057 = vmatprep.subr.msk.bf16.mxu1 %vm3632_vm2, %v3055_v41 }
 0xa12   : > { %v3268_v28 = vpop.eup %3267 }
 0xa13   : > { %v3270_v42 = vpop.eup %3269  ;;  %2941 = vmatprep.mubr.msk.f32.mxu1 %vm782_vm3, %v3268_v28  ;;  %v2052_v60 = vsel %vm782_vm3, %v3268_v28, 0.0 }
 0xa14   : > { %2942 = vmatmul.mubr.msk.f32.vlgmr.msra.gmra.mrb[16].mxu1 %vm782_vm3, %v3270_v42 }
 0xa15   : > { %3060 = vmatpush3.bf16.xpose.msk.msra.mxu1 %vm3632_vm2, %v3055_v41  ;;  %2948 = vmatprep.mubr.msk.f32.mxu1 %vm694_vm1, %v2161_v43 }
 0xa1c   : > { %2949 = vmatmul.mubr.msk.f32.vlgmr.msra.gmra.mrb[18].mxu1 %vm694_vm1, %v2163_v44 }
 0xae7   : > { %v3823_v45 = vpop.f32.mrb[16].mxu1 }
 0xae8   : > { %v3825_v46 = vpop.f32.mrb[17].mxu1 }
 0xaef   : > { %v2950_v47 = vpop.f32.mrb[18].mxu1 }
 0xaf0   : > { %v2242_v48 = vpop.f32.mrb[19].mxu1  ;;  %v2254_v49 = vsel %vm782_vm3, %v2950_v47, -inf }
 0xaf1   : > { %2255 = vmax.xlane.f32.xlu0 %v2254_v49  ;;  %v2251_v50 = vsel %vm782_vm3, %v2242_v48, -inf }
 0xaf2   : > { %2252 = vmax.xlane.f32.xlu1 %v2251_v50 }
 0xaf6   : > { %998 = vadd.xlane.f32.xlu1 %v997_v24 }
 0xafa   : > { %1001 = vadd.xlane.f32.xlu1 %v1000_v51 }
 0xafe   : > { %1209 = vadd.xlane.f32.xlu1 %v1208_v52 }
 0xb02   : > { %1212 = vadd.xlane.f32.xlu1 %v1211_v53 }
 0xb06   : > { %1420 = vadd.xlane.f32.xlu1 %v1419_v54 }
 0xb07   : > { %3239 = vrot.lane.b32.xlu0 %v3638_v26, %s3422_s19  ;;  %v2055_v26 = vsel %vm782_vm3, %v3270_v42, 0.0 }
 0xb0a   : > { %1631 = vadd.xlane.f32.xlu1 %v1630_v30 }
 0xb0e   : > { %1634 = vadd.xlane.f32.xlu1 %v1633_v31 }
 0xb12   : > { %1842 = vadd.xlane.f32.xlu1 %v1841_v32 }
 0xb16   : > { %1845 = vadd.xlane.f32.xlu1 %v1844_v34 }
 0xb1a   : > { %2053 = vadd.xlane.f32.xlu1 %v2052_v60 }
 0xb1e   : > { %2056 = vadd.xlane.f32.xlu1 %v2055_v26 }
 0xb26   : > { %1423 = vadd.xlane.f32.xlu0 %v1422_v23 }
 0xb2a   : > { %796 = vadd.xlane.f32.xlu0 %v795_v27 }
 0xb7e   : > { %v2256_v55 = vpop.xlane.xlu0 %2255 }
 0xb7f   : > { %v2258_v56 = vsub.f32 %v2950_v47, %v2256_v55  ;;  %v2253_v57 = vpop.xlane.xlu1 %2252 }
 0xb80   : > { %v2257_v58 = vsub.f32 %v2242_v48, %v2253_v57 }
 0xb81   : > { %v2261_v63 = vmul.f32 1.442695, %v2258_v56 }
 0xb82   : > { %v2259_v0 = vmul.f32 1.442695, %v2257_v58  ;;  %v3240_v5 = vpop.permute.xlu0 %3239 }
 0xb83   : > { %3271 = vpow2.f32 %v2261_v63  ;;  %v3242_v6 = vunpack.i.h.bf16 %v3240_v5  ;;  %v3241_v9 = vunpack.i.l.bf16 %v3240_v5  ;;  %v999_v10 = vpop.xlane.xlu1 %998 }
 0xb84   : > { %3273 = vpow2.f32 %v2259_v0 }
 0xb85   : > { %v3061_v11 = vpack.c.bf16 %v3242_v6, %v3241_v9  ;;  %3275 = vrcp.f32 %v999_v10  ;;  %v2373_v6 = vld [vmem:[%s3586_s27] sm:$0xff]  ;;  %v2374_v9 = vld [vmem:[%s3586_s27 + $0x8] sm:$0xff]  ;;  %v2375_v10 = vld [vmem:[%s3586_s27 + $0x10] sm:$0xff] }
 0xb87   : > { %3062 = vmatprep.subr.bf16.mxu0 %v3061_v11  ;;  %v1002_v61 = vpop.xlane.xlu1 %1001 }
 0xb88   : > { %3064 = vmatpush3.bf16.msra.mxu0 %v3061_v11  ;;  %v3065_v11 = vpack.c.bf16 %v2374_v9, %v2373_v6 }
 0xb8a   : > { %3066 = vmatprep.subr.bf16.mxu0 %v3065_v11 }
 0xb8b   : > { %v1210_v12 = vpop.xlane.xlu1 %1209 }
 0xb8d   : > { %v3272_v59 = vpop.eup %3271 }
 0xb8e   : > { %v3274_v13 = vpop.eup %3273  ;;  %v2266_v19 = vsel %vm782_vm3, %v3272_v59, 0.0 }
 0xb8f   : > { %v3276_v14 = vpop.eup %3275  ;;  %2955 = vmatprep.mubr.msk.f32.mxu0 %vm782_vm3, %v3274_v13  ;;  %v1213_v15 = vpop.xlane.xlu1 %1212  ;;  %v2263_v16 = vsel %vm782_vm3, %v3274_v13, 0.0 }
 0xb90   : > { %3277 = vrcp.f32 %v1213_v15  ;;  %2956 = vmatmul.mubr.msk.f32.vlgmr.msra.gmra.mrb[14].mxu0 %vm782_vm3, %v3272_v59  ;;  %2264 = vadd.xlane.f32.xlu1 %v2263_v16  ;;  %v1092_v17 = vmul.f32 %v3276_v14, %v3721_v38 }
 0xb91   : > { %3279 = vrcp.f32 %v1002_v61  ;;  %v2376_v61 = vld [vmem:[%s3586_s27 + $0x18] sm:$0xff]  ;;  %3068 = vmatpush3.bf16.msra.mxu0 %v3065_v11 }
 0xb92   : > { %1096 = vrot.lane.b32.xlu0 %v1092_v17, %s3423_s24  ;;  %3281 = vrcp.f32 %v1210_v12  ;;  %v3069_v12 = vpack.c.bf16 %v2376_v61, %v2375_v10 }
 0xb93   : > { %v1421_v18 = vpop.xlane.xlu1 %1420 }
 0xb94   : > { %2267 = vadd.xlane.f32.xlu1 %v2266_v19  ;;  %3283 = vrcp.f32 %v1421_v18  ;;  %3070 = vmatprep.subr.bf16.mxu0 %v3069_v12 }
 0xb95   : > { %3072 = vmatpush3.bf16.msra.mxu0 %v3069_v12 }
 0xb97   : > { %v1632_v20 = vpop.xlane.xlu1 %1631 }
 0xb98   : > { %799 = vadd.xlane.f32.xlu1 %v798_v21  ;;  %3285 = vrcp.f32 %v1632_v20 }
 0xb9a   : > { %v3278_v22 = vpop.eup %3277 }
 0xb9b   : > { %v1635_v29 = vpop.xlane.xlu1 %1634  ;;  %v1304_v33 = vmul.f32 %v3278_v22, %v3723_v39  ;;  %v3280_v25 = vpop.eup %3279  ;;  %v2734_v22 = vld [vmem:[%s495_s15] ss:$0 sm:$0xff] }
 0xb9c   : > { %v1093_v28 = vmul.f32 %v3280_v25, %v3719_v37  ;;  %v3282_v42 = vpop.eup %3281 }
 0xb9d   : > { %1309 = vrot.lane.b32.xlu0 %v1304_v33, %s3424_s21  ;;  %v1303_v43 = vmul.f32 %v3282_v42, %v3725_v40 }
 0xb9e   : > { %v3284_v44 = vpop.eup %3283 }
 0xb9f   : > { %v1843_v38 = vpop.xlane.xlu1 %1842  ;;  %v1514_v39 = vmul.f32 %v3284_v44, %v3752_v4 }
 0xba0   : > { %3287 = vrcp.f32 %v1843_v38 }
 0xba2   : > { %v3286_v47 = vpop.eup %3285 }
 0xba3   : > { %v1846_v41 = vpop.xlane.xlu1 %1845  ;;  %v1725_v49 = vmul.f32 %v3286_v47, %v3779_v36 }
 0xba7   : > { %v2054_v62 = vpop.xlane.xlu1 %2053 }
 0xba8   : > { %3289 = vrcp.f32 %v2054_v62 }
 0xba9   : > { %1098 = vrot.lane.b32.xlu1 %v1093_v28, %s3423_s24  ;;  %s504_s24 = scalar_lea.vmem %s3927_s8, %s2669_s13 }
 0xbaa   : > { %v3288_v50 = vpop.eup %3287 }
 0xbab   : > { %v1936_v24 = vmul.f32 %v3288_v50, %v3806_v8  ;;  %v2057_v4 = vpop.xlane.xlu1 %2056 }
 0xbad   : > { %1307 = vrot.lane.b32.xlu1 %v1303_v43, %s3424_s21 }
 0xbb1   : > { %1518 = vrot.lane.b32.xlu1 %v1514_v39, %s3425_s22 }
 0xbb2   : > { %v3290_v40 = vpop.eup %3289 }
 0xbb3   : > { %v1424_v48 = vpop.xlane.xlu0 %1423  ;;  %v2147_v51 = vmul.f32 %v3290_v40, %v3825_v46 }
 0xbb4   : > { %3291 = vrcp.f32 %v1424_v48 }
 0xbb5   : > { %1729 = vrot.lane.b32.xlu1 %v1725_v49, %s3426_s25  ;;  %3293 = vrcp.f32 %v1635_v29 }
 0xbb7   : > { %v797_v37 = vpop.xlane.xlu0 %796 }
 0xbb8   : > { %3295 = vrcp.f32 %v797_v37 }
 0xbb9   : > { %1940 = vrot.lane.b32.xlu1 %v1936_v24, %s3427_s30  ;;  %3297 = vrcp.f32 %v1846_v41 }
 0xbba   : > { %3299 = vrcp.f32 %v2057_v4 }
 0xbbd   : > { %2151 = vrot.lane.b32.xlu1 %v2147_v51, %s3428_s16 }
 0xbbe   : > { %v3292_v52 = vpop.eup %3291 }
 0xbbf   : > { %v1515_v36 = vmul.f32 %v3292_v52, %v3750_v3  ;;  %v3294_v53 = vpop.eup %3293 }
 0xbc0   : > { %v1726_v8 = vmul.f32 %v3294_v53, %v3777_v35 }
 0xbc1   : > { %1520 = vrot.lane.b32.xlu0 %v1515_v36, %s3425_s22 }
 0xbc2   : > { %v3296_v54 = vpop.eup %3295 }
 0xbc3   : > { %v890_v30 = vmul.f32 %v3296_v54, %v3687_v2  ;;  %v3298_v31 = vpop.eup %3297 }
 0xbc4   : > { %v1937_v32 = vmul.f32 %v3298_v31, %v3804_v7  ;;  %v3300_v46 = vpop.eup %3299 }
 0xbc5   : > { %892 = vst.msk [vmem:[#allocation2] sm:$0xff] %vm694_vm1, %v890_v30  ;;  %1731 = vrot.lane.b32.xlu0 %v1726_v8, %s3426_s25  ;;  %v2148_v34 = vmul.f32 %v3300_v46, %v3823_v45 }
 0xbc9   : > { %1942 = vrot.lane.b32.xlu0 %v1937_v32, %s3427_s30 }
 0xbcd   : > { %2153 = vrot.lane.b32.xlu0 %v2148_v34, %s3428_s16 }
 0xc04   : > { %v1097_v3 = vpop.permute.xlu0 %1096 }
 0xc05   : > { %1103 = vst.msk [vmem:[#allocation2] sm:$0xff] %vm1102_vm4, %v1097_v3 }
 0xc0f   : > { %v1310_v27 = vpop.permute.xlu0 %1309 }
 0xc1d   : > { %v2265_v60 = vpop.xlane.xlu1 %2264 }
 0xc21   : > { %v2268_v26 = vpop.xlane.xlu1 %2267 }
 0xc25   : > { %v800_v2 = vpop.xlane.xlu1 %799 }
 0xc26   : > { %3301 = vrcp.f32 %v800_v2 }
 0xc27   : > { %3303 = vrcp.f32 %v2268_v26 }
 0xc28   : > { %3305 = vrcp.f32 %v2265_v60 }
 0xc29   : > { %v1099_v35 = vpop.permute.xlu1 %1098 }
 0xc2d   : > { %v1308_v23 = vpop.permute.xlu1 %1307 }
 0xc2e   : > { %1314 = vst.msk [vmem:[#allocation2] sm:$0xff] %vm1313_vm5, %v1308_v23 }
 0xc30   : > { %v3302_v7 = vpop.eup %3301 }
 0xc31   : > { %v891_v55 = vmul.f32 %v3302_v7, %v3685_v1  ;;  %v1519_v56 = vpop.permute.xlu1 %1518  ;;  %v3304_v59 = vpop.eup %3303 }
 0xc32   : > { %1525 = vst.msk [vmem:[#allocation2] sm:$0xff] %vm1524_vm6, %v1519_v56  ;;  %v3306_v14 = vpop.eup %3305 }
 0xc33   : > { %893 = vst.msk [vmem:[#allocation2 + $0x8] sm:$0xff] %vm694_vm1, %v891_v55  ;;  %v1521_v45 = vpop.permute.xlu0 %1520 }
 0xc34   : > { %1104 = vst.msk [vmem:[#allocation2 + $0x8] sm:$0xff] %vm1102_vm4, %v1099_v35 }
 0xc35   : > { %1315 = vst.msk [vmem:[#allocation2 + $0x8] sm:$0xff] %vm1313_vm5, %v1310_v27  ;;  %v1730_v57 = vpop.permute.xlu1 %1729 }
 0xc36   : > { %1526 = vst.msk [vmem:[#allocation2 + $0x8] sm:$0xff] %vm1524_vm6, %v1521_v45 }
 0xc37   : > { %1736 = vst.msk [vmem:[#allocation2] sm:$0xff] %vm1735_vm7, %v1730_v57  ;;  %v1732_v58 = vpop.permute.xlu0 %1731 }
 0xc38   : > { %1737 = vst.msk [vmem:[#allocation2 + $0x8] sm:$0xff] %vm1735_vm7, %v1732_v58 }
 0xc39   : > { %v1941_v1 = vpop.permute.xlu1 %1940 }
 0xc3a   : > { %1947 = vst.msk [vmem:[#allocation2] sm:$0xff] %vm1946_vm8, %v1941_v1 }
 0xc3b   : > { %v1943_v63 = vpop.permute.xlu0 %1942 }
 0xc3c   : > { %1948 = vst.msk [vmem:[#allocation2 + $0x8] sm:$0xff] %vm1946_vm8, %v1943_v63 }
 0xc3d   : > { %v2152_v0 = vpop.permute.xlu1 %2151 }
 0xc3e   : > { %2158 = vst.msk [vmem:[#allocation2] sm:$0xff] %vm2157_vm9, %v2152_v0 }
 0xc3f   : > { %v2154_v5 = vpop.permute.xlu0 %2153 }
 0xc40   : > { %2159 = vst.msk [vmem:[#allocation2 + $0x8] sm:$0xff] %vm2157_vm9, %v2154_v5 }
 0xc63   : > { %v2957_v13 = vpop.f32.mrb[14].mxu0 }
 0xc64   : > { %v2359_v15 = vmul.f32 %v3304_v59, %v2957_v13  ;;  %v2349_v16 = vpop.f32.mrb[15].mxu0 }
 0xc65   : > { %v2358_v17 = vmul.f32 %v3306_v14, %v2349_v16 }
 0xc66   : > { %2364 = vrot.lane.b32.xlu0 %v2359_v15, %s3429_s26 }
 0xc67   : > { %2362 = vrot.lane.b32.xlu1 %v2358_v17, %s3429_s26 }
 0xcd8   : > { %v2365_v18 = vpop.permute.xlu0 %2364 }
 0xcd9   : > { %2370 = vst.msk [vmem:[#allocation2 + $0x8] sm:$0xff] %vm2368_vm10, %v2365_v18  ;;  %v2363_v19 = vpop.permute.xlu1 %2362 }
 0xcda   : > { %2369 = vst.msk [vmem:[#allocation2] sm:$0xff] %vm2368_vm10, %v2363_v19 }
 0xce0   : > { %v2372_v21 = vld [vmem:[#allocation2 + $0x8] sm:$0xff] }
 0xce1   : > { %v2371_v20 = vld [vmem:[#allocation2] sm:$0xff] }
 0xce2   : > { %2966 = vmatprep.mubr.msk.f32.mxu0 %vm520_vm0, %v2371_v20 }
 0xce3   : > { %2967 = vmatmul.mubr.msk.f32.vlgmr.msra.gmra.mrb[16].mxu0 %vm520_vm0, %v2372_v21 }
 0xdb6   : > { %v2968_v29 = vpop.f32.mrb[16].mxu0 }
 0xdb7   : > { %v2462_v33 = vadd.f32 %v2968_v29, %v2734_v22  ;;  %v2456_v38 = vpop.f32.mrb[17].mxu0 }
 0xdb8   : > { %v2457_v25 = vadd.f32 %v2734_v22, %v2456_v38 }
 0xdb9   : > { %2466 = vst.msk [vmem:[%s504_s24 + $0x8] sm:$0xff] %vm520_vm0, %v2462_v33 }
 0xdba   : > { %2465 = vst.msk [vmem:[%s504_s24] sm:$0xff] %vm520_vm0, %v2457_v25 }
 0xdbb PF: > { %s21_s12 = sadd.s32 1, %s3403_s12   ;;  %s3935_s20 = sld [smem:[#allocation6_spill]] }
 0xdbc   : > { %p18_p7 = scmp.ge.s32.totalorder %s21_s12, 6   ;;  %s3936_s27 = smov %s3379_s28 }
 0xdbd   : > { %s3937_s28 = smov %s3383_s29  ;;  %s3938_s29 = smov %s3540_s23 }
 0xdbe   : > { %s3939_s30 = smov %s3395_s10  ;;  %s3940_s9 = smov %s3399_s11 }
 0xdbf   : > { %s3941_s10 = smov %s3944_s14  ;;  %20 = sbr.rel (!%p18_p7) target bundleno = 5 (0x5), region = 113 }
 0xdc1   : > { %s3942_s11 = smov %s3935_s20 }
 0xdc6   :  { %2496 = vsyncpa [#allocation4], 1 }
 0xdc7   :  { %2498 = vsyncpa [#allocation4 + $0x1], 1 }

</bundles_post_ra>
